<compile_context>
chip_gen: v5e
topology: v5e:2x2
jax: 0.10.0
libtpu: 0.0.40
codegen_flags: <defaults>
</compile_context>

<pallas_src>
import functools
import math

import jax
import jax.numpy as jnp
from jax.experimental import pallas as pl
from jax.experimental.pallas import tpu as pltpu

VMEM_LIMIT_BYTES = 48 * 1024 * 1024   # explicit scoped-VMEM budget (headroom on v7x 64 MiB)
TM_TARGET = 256                       # row-tile target (sublane axis, multiple of 8)
TN_TARGET = 256                       # col-tile target (lane axis, multiple of 128)
LN_EPS = 1e-5


def _pick_tile(dim, target, granule):
    """Largest multiple of `granule` that divides `dim` and is <= target, else full dim."""
    if dim <= target:
        return dim
    t = (target // granule) * granule
    while t >= granule:
        if dim % t == 0:
            return t
        t -= granule
    # TODO(synk): pad odd dims (e.g. vocab not a multiple of 128) instead of using a full block.
    return dim


# --------------------------- fused LN/matmul kernel ---------------------------

def _make_fused_linear_kernel(has_ln, has_res, activation):
    def kernel(*refs):
        idx = 0
        x_ref = refs[idx]; idx += 1
        if has_ln:
            g_ref, s_ref = refs[idx], refs[idx + 1]; idx += 2
        w_ref, b_ref = refs[idx], refs[idx + 1]; idx += 2
        if has_res:
            r_ref = refs[idx]; idx += 1
        o_ref = refs[idx]

        x = x_ref[...].astype(jnp.float32)                       # (tm, K)
        if has_ln:
            mu = jnp.mean(x, axis=-1, keepdims=True)
            var = jnp.mean((x - mu) ** 2, axis=-1, keepdims=True)  # biased, matches torch LN
            x = (x - mu) * jax.lax.rsqrt(var + LN_EPS)
            x = x * g_ref[...].astype(jnp.float32) + s_ref[...].astype(jnp.float32)

        w = w_ref[0]                                             # (K, tn) -- bf16 or f32
        out = jnp.dot(x.astype(w.dtype), w, preferred_element_type=jnp.float32)
        out = out + b_ref[0].astype(jnp.float32)                 # (1, tn) broadcast

        if activation == 'gelu':                                 # tanh approximation
            c = math.sqrt(2.0 / math.pi)
            out = 0.5 * out * (1.0 + jnp.tanh(c * (out + 0.044715 * out * out * out)))

        if has_res:
            out = out + r_ref[0].astype(jnp.float32)             # fused residual add

        o_ref[0] = out.astype(o_ref.dtype)
    return kernel


def fused_linear(x2d, w, b, *, ln=None, residual=None, activation=None,
                 tm_target=TM_TARGET, tn_target=TN_TARGET):
    """y[g] = act(LayerNorm?(x) @ w[g] + b[g]) (+ residual[g]).

    x2d: (M, K) f32.  w: (K, N) or (G, K, N).  b: (1, N) or (G, 1, N).
    ln: optional (scale, shift), each (1, K).  residual: optional (M, N)/(G, M, N).
    Returns (M, N) or (G, M, N) in x2d.dtype.
    """
    squeeze = (w.ndim == 2)
    if squeeze:
        w, b = w[None], b[None]
    if residual is not None and residual.ndim == 2:
        residual = residual[None]

    M, K = x2d.shape
    G, Kw, N = w.shape
    assert Kw == K
    tm = _pick_tile(M, tm_target, 8)
    tn = _pick_tile(N, tn_target, 128)
    nm, nn = M // tm, N // tn
    grid = (nm, G, nn)                     # N innermost: x row-tile stays VMEM-resident

    has_ln = ln is not None
    has_res = residual is not None

    in_specs = [pl.BlockSpec((tm, K), lambda m, g, n: (m, 0))]
    inputs = [x2d]
    if has_ln:
        in_specs += [pl.BlockSpec((1, K), lambda m, g, n: (0, 0)),
                     pl.BlockSpec((1, K), lambda m, g, n: (0, 0))]
        inputs += [ln[0], ln[1]]
    in_specs += [pl.BlockSpec((1, K, tn), lambda m, g, n: (g, 0, n)),
                 pl.BlockSpec((1, 1, tn), lambda m, g, n: (g, 0, n))]
    inputs += [w, b]
    io_aliases = {}
    if has_res:
        in_specs.append(pl.BlockSpec((1, tm, tn), lambda m, g, n: (g, m, n)))
        inputs.append(residual)
        io_aliases = {len(inputs) - 1: 0}  # write result in-place into the residual buffer

    out = pl.pallas_call(
        _make_fused_linear_kernel(has_ln, has_res, activation),
        out_shape=jax.ShapeDtypeStruct((G, M, N), x2d.dtype),
        grid=grid,
        in_specs=in_specs,
        out_specs=pl.BlockSpec((1, tm, tn), lambda m, g, n: (g, m, n)),
        input_output_aliases=io_aliases,
        compiler_params=pltpu.CompilerParams(
            dimension_semantics=("parallel", "parallel", "parallel"),
            vmem_limit_bytes=VMEM_LIMIT_BYTES),
    )(*inputs)
    return out[0] if squeeze else out


# ------------------------ flash-style causal attention ------------------------

def _flash_attn_kernel(q_ref, k_ref, v_ref, o_ref, m_ref, l_ref, acc_ref,
                       *, n_heads, head_dim, scale, tq, tk):
    qi = pl.program_id(1)
    ki = pl.program_id(2)
    nk = pl.num_programs(2)

    @pl.when(ki == 0)
    def _init():
        m_ref[...] = jnp.full_like(m_ref, -1e30)
        l_ref[...] = jnp.zeros_like(l_ref)
        acc_ref[...] = jnp.zeros_like(acc_ref)

    q_start = qi * tq
    k_start = ki * tk
    q_last = q_start + tq - 1
    k_last = k_start + tk - 1

    def _update(apply_mask):
        q_all = q_ref[0].astype(jnp.float32) * scale            # (tq, E), pre-scaled q
        k_all = k_ref[0].astype(jnp.float32)                    # (tk, E)
        v_all = v_ref[0].astype(jnp.float32)                    # (tk, E)
        if apply_mask:
            rows = q_start + jax.lax.broadcasted_iota(jnp.int32, (tq, tk), 0)
            cols = k_start + jax.lax.broadcasted_iota(jnp.int32, (tq, tk), 1)
            causal = cols > rows
        for h in range(n_heads):                                # static unroll over heads
            lo, hi = h * head_dim, (h + 1) * head_dim
            q = q_all[:, lo:hi]
            k = k_all[:, lo:hi]
            v = v_all[:, lo:hi]
            # scores (tq, tk): contract head_dim without an explicit transpose
            s = jax.lax.dot_general(q, k, (((1,), (1,)), ((), ())),
                                    preferred_element_type=jnp.float32)
            if apply_mask:
                s = jnp.where(causal, jnp.float32(-1e30), s)
            m_prev = m_ref[h]                                   # (tq, 1)
            m_new = jnp.maximum(m_prev, jnp.max(s, axis=-1, keepdims=True))
            alpha = jnp.exp(m_prev - m_new)
            p = jnp.exp(s - m_new)                              # (tq, tk)
            acc_ref[h] = acc_ref[h] * alpha + jnp.dot(
                p, v, preferred_element_type=jnp.float32)       # (tq, Dh)
            l_ref[h] = l_ref[h] * alpha + jnp.sum(p, axis=-1, keepdims=True)
            m_ref[h] = m_new

    @pl.when(k_last <= q_start)                 # fully visible kv tile: no mask work
    def _visible():
        _update(apply_mask=False)

    @pl.when(jnp.logical_and(k_last > q_start, k_start <= q_last))   # diagonal tile
    def _diagonal():
        _update(apply_mask=True)
    # kv tiles with k_start > q_last are entirely in the causal future -> skipped

    @pl.when(ki == nk - 1)
    def _finalize():
        for h in range(n_heads):
            lo, hi = h * head_dim, (h + 1) * head_dim
            ctx = acc_ref[h] * pl.reciprocal(l_ref[h], approx=False)
            o_ref[:, lo:hi] = ctx.astype(o_ref.dtype)


def causal_attention(qkv, *, batch, seq, n_heads,
                     tq_target=TM_TARGET, tk_target=TM_TARGET):
    """qkv: (3, B*S, E) slab (q/k/v stacked) -> causal multi-head attention ctx (B*S, E)."""
    _, M, E = qkv.shape
    assert M == batch * seq and E % n_heads == 0
    head_dim = E // n_heads
    scale = 1.0 / math.sqrt(head_dim)
    tq = _pick_tile(seq, tq_target, 8)
    tk = _pick_tile(seq, tk_target, 8)
    nq, nk = seq // tq, seq // tk
    grid = (batch, nq, nk)

    kernel = functools.partial(_flash_attn_kernel, n_heads=n_heads,
                               head_dim=head_dim, scale=scale, tq=tq, tk=tk)
    return pl.pallas_call(
        kernel,
        out_shape=jax.ShapeDtypeStruct((M, E), qkv.dtype),
        grid=grid,
        in_specs=[pl.BlockSpec((1, tq, E), lambda b, qi, ki: (0, b * nq + qi, 0)),
                  pl.BlockSpec((1, tk, E), lambda b, qi, ki: (1, b * nk + ki, 0)),
                  pl.BlockSpec((1, tk, E), lambda b, qi, ki: (2, b * nk + ki, 0))],
        out_specs=pl.BlockSpec((tq, E), lambda b, qi, ki: (b * nq + qi, 0)),
        scratch_shapes=[pltpu.VMEM((n_heads, tq, 1), jnp.float32),        # running max
                        pltpu.VMEM((n_heads, tq, 1), jnp.float32),        # running denom
                        pltpu.VMEM((n_heads, tq, head_dim), jnp.float32)],  # accumulator
        compiler_params=pltpu.CompilerParams(
            dimension_semantics=("parallel", "parallel", "arbitrary"),
            vmem_limit_bytes=VMEM_LIMIT_BYTES),
    )(qkv, qkv, qkv)


# ------------------------------ model wrapper -------------------------------

def transformer_block(x2d, p, config, batch, seq):
    # fused: LayerNorm1 -> stacked QKV projection -> (3, B*S, E)
    qkv = fused_linear(x2d, p['attn']['wqkv'], p['attn']['bqkv'],
                       ln=(p['norm1']['scale'], p['norm1']['shift']))
    # flash-style multi-head causal attention (heads split in-kernel)
    ctx = causal_attention(qkv, batch=batch, seq=seq, n_heads=config['n_heads'])
    # fused: output projection + bias + residual add (in-place into residual buffer)
    # TODO(synk): attention/residual dropout is identity here (eval mode, rate=0.0)
    x2d = fused_linear(ctx, p['attn']['wo'], p['attn']['bo'], residual=x2d)
    # fused: LayerNorm2 -> FFN up-projection -> GELU
    h = fused_linear(x2d, p['ffn']['w1'], p['ffn']['b1'],
                     ln=(p['norm2']['scale'], p['norm2']['shift']), activation='gelu')
    # fused: FFN down-projection + bias + residual add
    x2d = fused_linear(h, p['ffn']['w2'], p['ffn']['b2'], residual=x2d)
    return x2d


def gpt_forward(in_idx, params, config):
    B, S = in_idx.shape
    E = config['embedding_dim']
    # token & position embedding gathers stay in JAX (XLA gather); everything
    # downstream runs in Pallas kernels.
    x = params['tok_emb'][in_idx] + params['pos_emb'][None, :S, :]
    # TODO(synk): dropout_emb is identity (eval mode / dropout_rate = 0.0)
    x2d = x.reshape(B * S, E).astype(jnp.float32)
    for blk in params['blocks']:
        x2d = transformer_block(x2d, blk, config, B, S)
    # fused: final LayerNorm -> LM head, tiled over the vocab axis
    logits = fused_linear(x2d, params['out_head']['w'], params['out_head']['b'],
                          ln=(params['final_norm']['scale'],
                              params['final_norm']['shift']))
    return logits.reshape(B, S, config['vocab_size'])


# ----------------------------- parameter init -------------------------------

def init_params(key, config, param_dtype=jnp.bfloat16):
    """Matmul weights in bf16 (MXU-native, halves weight HBM traffic); LayerNorm
    params, biases and embeddings in f32; all accumulation is f32 in-kernel."""
    E = config['embedding_dim']
    V = config['vocab_size']
    C = config['context_length']
    L = config['n_layers']

    def dense(k, fin, fout):
        kw, kb = jax.random.split(k)
        w = (jax.random.normal(kw, (fin, fout), jnp.float32) * 0.02).astype(param_dtype)
        b = jax.random.normal(kb, (1, fout), jnp.float32) * 0.02
        return w, b

    keys = jax.random.split(key, 3 + L)
    params = {
        'tok_emb': jax.random.normal(keys[0], (V, E), jnp.float32) * 0.02,
        'pos_emb': jax.random.normal(keys[1], (C, E), jnp.float32) * 0.02,
    }
    blocks = []
    for li in range(L):
        bk = jax.random.split(keys[3 + li], 6)
        wq, bq = dense(bk[0], E, E)
        wk, bk_ = dense(bk[1], E, E)
        wv, bv = dense(bk[2], E, E)
        wo, bo = dense(bk[3], E, E)
        w1, b1 = dense(bk[4], E, 4 * E)
        w2, b2 = dense(bk[5], 4 * E, E)
        blocks.append({
            'norm1': {'scale': jnp.ones((1, E), jnp.float32),
                      'shift': jnp.zeros((1, E), jnp.float32)},
            'norm2': {'scale': jnp.ones((1, E), jnp.float32),
                      'shift': jnp.zeros((1, E), jnp.float32)},
            'attn': {'wqkv': jnp.stack([wq, wk, wv], axis=0),   # (3, E, E)
                     'bqkv': jnp.stack([bq, bk_, bv], axis=0),  # (3, 1, E)
                     'wo': wo, 'bo': bo},
            'ffn': {'w1': w1, 'b1': b1, 'w2': w2, 'b2': b2},
        })
    params['blocks'] = blocks
    params['final_norm'] = {'scale': jnp.ones((1, E), jnp.float32),
                            'shift': jnp.zeros((1, E), jnp.float32)}
    wh, bh = dense(keys[2], E, V)
    params['out_head'] = {'w': wh, 'b': bh}
    return params


# ---------------------------------- main -------------------------------------

if __name__ == "__main__":
    config = dict(vocab_size=64, context_length=16, embedding_dim=32,
                  n_heads=4, n_layers=2, dropout_rate=0.0, qkv_bias=True)
    key = jax.random.PRNGKey(0)
    kp, kx = jax.random.split(key)
    params = init_params(kp, config)

    B, S = 2, 8
    in_idx = jax.random.randint(kx, (B, S), 0, config['vocab_size'], dtype=jnp.int32)

    fwd = jax.jit(lambda idx, prm: gpt_forward(idx, prm, config))
    logits = jax.block_until_ready(fwd(in_idx, params))
    assert logits.shape == (B, S, config['vocab_size'])
    assert bool(jnp.all(jnp.isfinite(logits)))
    print("KERNEL_OK")
</pallas_src>

<mosaic_0001>
module attributes {stable_mosaic.version = 11 : i64} {
  func.func @kernel(%arg0: i32, %arg1: i32, %arg2: i32, %arg3: memref<16x32xf32, #tpu.memory_space<vmem>>, %arg4: memref<1x32xf32, #tpu.memory_space<vmem>>, %arg5: memref<1x32xf32, #tpu.memory_space<vmem>>, %arg6: memref<1x32x32xbf16, #tpu.memory_space<vmem>>, %arg7: memref<1x1x32xf32, #tpu.memory_space<vmem>>, %arg8: memref<1x16x32xf32, #tpu.memory_space<vmem>>) attributes {dimension_semantics = [#tpu.dimension_semantics<parallel>, #tpu.dimension_semantics<parallel>, #tpu.dimension_semantics<parallel>], iteration_bounds = array<i64: 1, 3, 1>, scalar_prefetch = 0 : i64, scratch_operands = 0 : i64, tpu.core_type = #tpu.core_type<tc>, window_params = [{transform_indices = @transform_0, window_bounds = array<i64: 16, 32>}, {pipeline_mode = #tpu.pipeline_mode<synchronous>, transform_indices = @transform_1, window_bounds = array<i64: 1, 32>}, {pipeline_mode = #tpu.pipeline_mode<synchronous>, transform_indices = @transform_2, window_bounds = array<i64: 1, 32>}, {transform_indices = @transform_3, window_bounds = array<i64: 1, 32, 32>}, {transform_indices = @transform_4, window_bounds = array<i64: 1, 1, 32>}, {transform_indices = @transform_5, window_bounds = array<i64: 1, 16, 32>}]} {
    %c0 = arith.constant 0 : index
    %c0_0 = arith.constant 0 : index
    %0 = vector.load %arg3[%c0, %c0_0] : memref<16x32xf32, #tpu.memory_space<vmem>>, vector<16x32xf32>
    %cst = arith.constant dense<0.000000e+00> : vector<16xf32>
    %1 = vector.multi_reduction <add>, %0, %cst [1] : vector<16x32xf32> to vector<16xf32>
    %2 = vector.shape_cast %1 : vector<16xf32> to vector<16x1xf32>
    %cst_1 = arith.constant 3.200000e+01 : f32
    %3 = vector.broadcast %cst_1 : f32 to vector<16x1xf32>
    %4 = arith.divf %2, %3 : vector<16x1xf32>
    %5 = vector.broadcast %4 : vector<16x1xf32> to vector<16x32xf32>
    %6 = arith.subf %0, %5 : vector<16x32xf32>
    %7 = arith.mulf %6, %6 : vector<16x32xf32>
    %cst_2 = arith.constant dense<0.000000e+00> : vector<16xf32>
    %8 = vector.multi_reduction <add>, %7, %cst_2 [1] : vector<16x32xf32> to vector<16xf32>
    %9 = vector.shape_cast %8 : vector<16xf32> to vector<16x1xf32>
    %cst_3 = arith.constant 3.200000e+01 : f32
    %10 = vector.broadcast %cst_3 : f32 to vector<16x1xf32>
    %11 = arith.divf %9, %10 : vector<16x1xf32>
    %12 = vector.broadcast %4 : vector<16x1xf32> to vector<16x32xf32>
    %13 = arith.subf %0, %12 : vector<16x32xf32>
    %cst_4 = arith.constant 9.99999974E-6 : f32
    %14 = vector.broadcast %cst_4 : f32 to vector<16x1xf32>
    %15 = arith.addf %11, %14 : vector<16x1xf32>
    %16 = math.rsqrt %15 : vector<16x1xf32>
    %17 = vector.broadcast %16 : vector<16x1xf32> to vector<16x32xf32>
    %18 = arith.mulf %13, %17 : vector<16x32xf32>
    %c0_5 = arith.constant 0 : index
    %c0_6 = arith.constant 0 : index
    %19 = vector.load %arg4[%c0_5, %c0_6] : memref<1x32xf32, #tpu.memory_space<vmem>>, vector<1x32xf32>
    %20 = vector.broadcast %19 : vector<1x32xf32> to vector<16x32xf32>
    %21 = arith.mulf %18, %20 : vector<16x32xf32>
    %c0_7 = arith.constant 0 : index
    %c0_8 = arith.constant 0 : index
    %22 = vector.load %arg5[%c0_7, %c0_8] : memref<1x32xf32, #tpu.memory_space<vmem>>, vector<1x32xf32>
    %23 = vector.broadcast %22 : vector<1x32xf32> to vector<16x32xf32>
    %24 = arith.addf %21, %23 : vector<16x32xf32>
    %c0_9 = arith.constant 0 : index
    %c0_10 = arith.constant 0 : index
    %c0_11 = arith.constant 0 : index
    %25 = vector.load %arg6[%c0_9, %c0_10, %c0_11] : memref<1x32x32xbf16, #tpu.memory_space<vmem>>, vector<1x32x32xbf16>
    %26 = vector.shape_cast %25 : vector<1x32x32xbf16> to vector<32x32xbf16>
    %27 = arith.truncf %24 : vector<16x32xf32> to vector<16x32xbf16>
    %cst_12 = arith.constant dense<0.000000e+00> : vector<16x32xf32>
    %28 = tpu.matmul %27, %26, %cst_12 {dimension_numbers = #tpu.dot_dimension_numbers<[1], [0], [0], [1], [0, 0, 1, 1], [], []>} : vector<16x32xbf16>, vector<32x32xbf16>, vector<16x32xf32> -> vector<16x32xf32>
    %c0_13 = arith.constant 0 : index
    %c0_14 = arith.constant 0 : index
    %c0_15 = arith.constant 0 : index
    %29 = vector.load %arg7[%c0_13, %c0_14, %c0_15] : memref<1x1x32xf32, #tpu.memory_space<vmem>>, vector<1x1x32xf32>
    %30 = vector.shape_cast %29 : vector<1x1x32xf32> to vector<1x32xf32>
    %31 = vector.broadcast %30 : vector<1x32xf32> to vector<16x32xf32>
    %32 = arith.addf %28, %31 : vector<16x32xf32>
    %c0_16 = arith.constant 0 : index
    %c0_17 = arith.constant 0 : index
    %c0_18 = arith.constant 0 : index
    %33 = vector.load %arg8[%c0_16, %c0_17, %c0_18] : memref<1x16x32xf32, #tpu.memory_space<vmem>>, vector<1x16x32xf32>
    %34 = vector.shape_cast %33 : vector<1x16x32xf32> to vector<16x32xf32>
    %35 = vector.shape_cast %32 : vector<16x32xf32> to vector<1x16x32xf32>
    tpu.vector_store %arg8[%c0_16, %c0_17, %c0_18], %35 {strides = array<i32>} : memref<1x16x32xf32, #tpu.memory_space<vmem>>, vector<1x16x32xf32>,
    return
  }
  func.func @transform_0(%arg0: i32, %arg1: i32, %arg2: i32) -> (i32, i32) {
    %c0_i32 = arith.constant 0 : i32
    %c0_i32_0 = arith.constant 0 : i32
    return %arg0, %c0_i32 : i32, i32
  }
  func.func @transform_1(%arg0: i32, %arg1: i32, %arg2: i32) -> (i32, i32) {
    %c0_i32 = arith.constant 0 : i32
    %c0_i32_0 = arith.constant 0 : i32
    %c0_i32_1 = arith.constant 0 : i32
    return %c0_i32, %c0_i32_0 : i32, i32
  }
  func.func @transform_2(%arg0: i32, %arg1: i32, %arg2: i32) -> (i32, i32) {
    %c0_i32 = arith.constant 0 : i32
    %c0_i32_0 = arith.constant 0 : i32
    %c0_i32_1 = arith.constant 0 : i32
    return %c0_i32, %c0_i32_0 : i32, i32
  }
  func.func @transform_3(%arg0: i32, %arg1: i32, %arg2: i32) -> (i32, i32, i32) {
    %c0_i32 = arith.constant 0 : i32
    %c0_i32_0 = arith.constant 0 : i32
    return %arg1, %c0_i32, %arg2 : i32, i32, i32
  }
  func.func @transform_4(%arg0: i32, %arg1: i32, %arg2: i32) -> (i32, i32, i32) {
    %c0_i32 = arith.constant 0 : i32
    %c0_i32_0 = arith.constant 0 : i32
    return %arg1, %c0_i32, %arg2 : i32, i32, i32
  }
  func.func @transform_5(%arg0: i32, %arg1: i32, %arg2: i32) -> (i32, i32, i32) {
    %c0_i32 = arith.constant 0 : i32
    return %arg1, %arg0, %arg2 : i32, i32, i32
  }
}

module attributes {stable_mosaic.version = 11 : i64} {
  func.func @kernel(%arg0: i32, %arg1: i32, %arg2: i32, %arg3: memref<16x32xf32, #tpu.memory_space<vmem>>, %arg4: memref<1x32xf32, #tpu.memory_space<vmem>>, %arg5: memref<1x32xf32, #tpu.memory_space<vmem>>, %arg6: memref<1x32x128xbf16, #tpu.memory_space<vmem>>, %arg7: memref<1x1x128xf32, #tpu.memory_space<vmem>>, %arg8: memref<1x16x128xf32, #tpu.memory_space<vmem>>) attributes {dimension_semantics = [#tpu.dimension_semantics<parallel>, #tpu.dimension_semantics<parallel>, #tpu.dimension_semantics<parallel>], iteration_bounds = array<i64: 1, 1, 1>, scalar_prefetch = 0 : i64, scratch_operands = 0 : i64, tpu.core_type = #tpu.core_type<tc>, window_params = [{transform_indices = @transform_0, window_bounds = array<i64: 16, 32>}, {pipeline_mode = #tpu.pipeline_mode<synchronous>, transform_indices = @transform_1, window_bounds = array<i64: 1, 32>}, {pipeline_mode = #tpu.pipeline_mode<synchronous>, transform_indices = @transform_2, window_bounds = array<i64: 1, 32>}, {transform_indices = @transform_3, window_bounds = array<i64: 1, 32, 128>}, {transform_indices = @transform_4, window_bounds = array<i64: 1, 1, 128>}, {transform_indices = @transform_5, window_bounds = array<i64: 1, 16, 128>}]} {
    %c0 = arith.constant 0 : index
    %c0_0 = arith.constant 0 : index
    %0 = vector.load %arg3[%c0, %c0_0] : memref<16x32xf32, #tpu.memory_space<vmem>>, vector<16x32xf32>
    %cst = arith.constant dense<0.000000e+00> : vector<16xf32>
    %1 = vector.multi_reduction <add>, %0, %cst [1] : vector<16x32xf32> to vector<16xf32>
    %2 = vector.shape_cast %1 : vector<16xf32> to vector<16x1xf32>
    %cst_1 = arith.constant 3.200000e+01 : f32
    %3 = vector.broadcast %cst_1 : f32 to vector<16x1xf32>
    %4 = arith.divf %2, %3 : vector<16x1xf32>
    %5 = vector.broadcast %4 : vector<16x1xf32> to vector<16x32xf32>
    %6 = arith.subf %0, %5 : vector<16x32xf32>
    %7 = arith.mulf %6, %6 : vector<16x32xf32>
    %cst_2 = arith.constant dense<0.000000e+00> : vector<16xf32>
    %8 = vector.multi_reduction <add>, %7, %cst_2 [1] : vector<16x32xf32> to vector<16xf32>
    %9 = vector.shape_cast %8 : vector<16xf32> to vector<16x1xf32>
    %cst_3 = arith.constant 3.200000e+01 : f32
    %10 = vector.broadcast %cst_3 : f32 to vector<16x1xf32>
    %11 = arith.divf %9, %10 : vector<16x1xf32>
    %12 = vector.broadcast %4 : vector<16x1xf32> to vector<16x32xf32>
    %13 = arith.subf %0, %12 : vector<16x32xf32>
    %cst_4 = arith.constant 9.99999974E-6 : f32
    %14 = vector.broadcast %cst_4 : f32 to vector<16x1xf32>
    %15 = arith.addf %11, %14 : vector<16x1xf32>
    %16 = math.rsqrt %15 : vector<16x1xf32>
    %17 = vector.broadcast %16 : vector<16x1xf32> to vector<16x32xf32>
    %18 = arith.mulf %13, %17 : vector<16x32xf32>
    %c0_5 = arith.constant 0 : index
    %c0_6 = arith.constant 0 : index
    %19 = vector.load %arg4[%c0_5, %c0_6] : memref<1x32xf32, #tpu.memory_space<vmem>>, vector<1x32xf32>
    %20 = vector.broadcast %19 : vector<1x32xf32> to vector<16x32xf32>
    %21 = arith.mulf %18, %20 : vector<16x32xf32>
    %c0_7 = arith.constant 0 : index
    %c0_8 = arith.constant 0 : index
    %22 = vector.load %arg5[%c0_7, %c0_8] : memref<1x32xf32, #tpu.memory_space<vmem>>, vector<1x32xf32>
    %23 = vector.broadcast %22 : vector<1x32xf32> to vector<16x32xf32>
    %24 = arith.addf %21, %23 : vector<16x32xf32>
    %c0_9 = arith.constant 0 : index
    %c0_10 = arith.constant 0 : index
    %c0_11 = arith.constant 0 : index
    %25 = vector.load %arg6[%c0_9, %c0_10, %c0_11] : memref<1x32x128xbf16, #tpu.memory_space<vmem>>, vector<1x32x128xbf16>
    %26 = vector.shape_cast %25 : vector<1x32x128xbf16> to vector<32x128xbf16>
    %27 = arith.truncf %24 : vector<16x32xf32> to vector<16x32xbf16>
    %cst_12 = arith.constant dense<0.000000e+00> : vector<16x128xf32>
    %28 = tpu.matmul %27, %26, %cst_12 {dimension_numbers = #tpu.dot_dimension_numbers<[1], [0], [0], [1], [0, 0, 1, 1], [], []>} : vector<16x32xbf16>, vector<32x128xbf16>, vector<16x128xf32> -> vector<16x128xf32>
    %c0_13 = arith.constant 0 : index
    %c0_14 = arith.constant 0 : index
    %c0_15 = arith.constant 0 : index
    %29 = vector.load %arg7[%c0_13, %c0_14, %c0_15] : memref<1x1x128xf32, #tpu.memory_space<vmem>>, vector<1x1x128xf32>
    %30 = vector.shape_cast %29 : vector<1x1x128xf32> to vector<1x128xf32>
    %31 = vector.broadcast %30 : vector<1x128xf32> to vector<16x128xf32>
    %32 = arith.addf %28, %31 : vector<16x128xf32>
    %cst_16 = arith.constant 5.000000e-01 : f32
    %33 = vector.broadcast %cst_16 : f32 to vector<16x128xf32>
    %34 = arith.mulf %33, %32 : vector<16x128xf32>
    %cst_17 = arith.constant 4.471500e-02 : f32
    %35 = vector.broadcast %cst_17 : f32 to vector<16x128xf32>
    %36 = arith.mulf %35, %32 : vector<16x128xf32>
    %37 = arith.mulf %36, %32 : vector<16x128xf32>
    %38 = arith.mulf %37, %32 : vector<16x128xf32>
    %39 = arith.addf %32, %38 : vector<16x128xf32>
    %cst_18 = arith.constant 0.797884583 : f32
    %40 = vector.broadcast %cst_18 : f32 to vector<16x128xf32>
    %41 = arith.mulf %40, %39 : vector<16x128xf32>
    %42 = math.tanh %41 : vector<16x128xf32>
    %cst_19 = arith.constant 1.000000e+00 : f32
    %43 = vector.broadcast %cst_19 : f32 to vector<16x128xf32>
    %44 = arith.addf %43, %42 : vector<16x128xf32>
    %45 = arith.mulf %34, %44 : vector<16x128xf32>
    %c0_20 = arith.constant 0 : index
    %c0_21 = arith.constant 0 : index
    %c0_22 = arith.constant 0 : index
    %46 = vector.load %arg8[%c0_20, %c0_21, %c0_22] : memref<1x16x128xf32, #tpu.memory_space<vmem>>, vector<1x16x128xf32>
    %47 = vector.shape_cast %46 : vector<1x16x128xf32> to vector<16x128xf32>
    %48 = vector.shape_cast %45 : vector<16x128xf32> to vector<1x16x128xf32>
    tpu.vector_store %arg8[%c0_20, %c0_21, %c0_22], %48 {strides = array<i32>} : memref<1x16x128xf32, #tpu.memory_space<vmem>>, vector<1x16x128xf32>,
    return
  }
  func.func @transform_0(%arg0: i32, %arg1: i32, %arg2: i32) -> (i32, i32) {
    %c0_i32 = arith.constant 0 : i32
    %c0_i32_0 = arith.constant 0 : i32
    return %arg0, %c0_i32 : i32, i32
  }
  func.func @transform_1(%arg0: i32, %arg1: i32, %arg2: i32) -> (i32, i32) {
    %c0_i32 = arith.constant 0 : i32
    %c0_i32_0 = arith.constant 0 : i32
    %c0_i32_1 = arith.constant 0 : i32
    return %c0_i32, %c0_i32_0 : i32, i32
  }
  func.func @transform_2(%arg0: i32, %arg1: i32, %arg2: i32) -> (i32, i32) {
    %c0_i32 = arith.constant 0 : i32
    %c0_i32_0 = arith.constant 0 : i32
    %c0_i32_1 = arith.constant 0 : i32
    return %c0_i32, %c0_i32_0 : i32, i32
  }
  func.func @transform_3(%arg0: i32, %arg1: i32, %arg2: i32) -> (i32, i32, i32) {
    %c0_i32 = arith.constant 0 : i32
    %c0_i32_0 = arith.constant 0 : i32
    return %arg1, %c0_i32, %arg2 : i32, i32, i32
  }
  func.func @transform_4(%arg0: i32, %arg1: i32, %arg2: i32) -> (i32, i32, i32) {
    %c0_i32 = arith.constant 0 : i32
    %c0_i32_0 = arith.constant 0 : i32
    return %arg1, %c0_i32, %arg2 : i32, i32, i32
  }
  func.func @transform_5(%arg0: i32, %arg1: i32, %arg2: i32) -> (i32, i32, i32) {
    %c0_i32 = arith.constant 0 : i32
    return %arg1, %arg0, %arg2 : i32, i32, i32
  }
}

module attributes {stable_mosaic.version = 11 : i64} {
  func.func @kernel(%arg0: i32, %arg1: i32, %arg2: i32, %arg3: memref<16x32xf32, #tpu.memory_space<vmem>>, %arg4: memref<1x32x32xbf16, #tpu.memory_space<vmem>>, %arg5: memref<1x1x32xf32, #tpu.memory_space<vmem>>, %arg6: memref<1x16x32xf32, #tpu.memory_space<vmem>>, %arg7: memref<1x16x32xf32, #tpu.memory_space<vmem>>) attributes {dimension_semantics = [#tpu.dimension_semantics<parallel>, #tpu.dimension_semantics<parallel>, #tpu.dimension_semantics<parallel>], iteration_bounds = array<i64: 1, 1, 1>, scalar_prefetch = 0 : i64, scratch_operands = 0 : i64, tpu.core_type = #tpu.core_type<tc>, window_params = [{transform_indices = @transform_0, window_bounds = array<i64: 16, 32>}, {transform_indices = @transform_1, window_bounds = array<i64: 1, 32, 32>}, {transform_indices = @transform_2, window_bounds = array<i64: 1, 1, 32>}, {transform_indices = @transform_3, window_bounds = array<i64: 1, 16, 32>}, {transform_indices = @transform_4, window_bounds = array<i64: 1, 16, 32>}]} {
    %c0 = arith.constant 0 : index
    %c0_0 = arith.constant 0 : index
    %0 = vector.load %arg3[%c0, %c0_0] : memref<16x32xf32, #tpu.memory_space<vmem>>, vector<16x32xf32>
    %c0_1 = arith.constant 0 : index
    %c0_2 = arith.constant 0 : index
    %c0_3 = arith.constant 0 : index
    %1 = vector.load %arg4[%c0_1, %c0_2, %c0_3] : memref<1x32x32xbf16, #tpu.memory_space<vmem>>, vector<1x32x32xbf16>
    %2 = vector.shape_cast %1 : vector<1x32x32xbf16> to vector<32x32xbf16>
    %3 = arith.truncf %0 : vector<16x32xf32> to vector<16x32xbf16>
    %cst = arith.constant dense<0.000000e+00> : vector<16x32xf32>
    %4 = tpu.matmul %3, %2, %cst {dimension_numbers = #tpu.dot_dimension_numbers<[1], [0], [0], [1], [0, 0, 1, 1], [], []>} : vector<16x32xbf16>, vector<32x32xbf16>, vector<16x32xf32> -> vector<16x32xf32>
    %c0_4 = arith.constant 0 : index
    %c0_5 = arith.constant 0 : index
    %c0_6 = arith.constant 0 : index
    %5 = vector.load %arg5[%c0_4, %c0_5, %c0_6] : memref<1x1x32xf32, #tpu.memory_space<vmem>>, vector<1x1x32xf32>
    %6 = vector.shape_cast %5 : vector<1x1x32xf32> to vector<1x32xf32>
    %7 = vector.broadcast %6 : vector<1x32xf32> to vector<16x32xf32>
    %8 = arith.addf %4, %7 : vector<16x32xf32>
    %c0_7 = arith.constant 0 : index
    %c0_8 = arith.constant 0 : index
    %c0_9 = arith.constant 0 : index
    %9 = vector.load %arg6[%c0_7, %c0_8, %c0_9] : memref<1x16x32xf32, #tpu.memory_space<vmem>>, vector<1x16x32xf32>
    %10 = vector.shape_cast %9 : vector<1x16x32xf32> to vector<16x32xf32>
    %11 = arith.addf %8, %10 : vector<16x32xf32>
    %c0_10 = arith.constant 0 : index
    %c0_11 = arith.constant 0 : index
    %c0_12 = arith.constant 0 : index
    %12 = vector.load %arg7[%c0_10, %c0_11, %c0_12] : memref<1x16x32xf32, #tpu.memory_space<vmem>>, vector<1x16x32xf32>
    %13 = vector.shape_cast %12 : vector<1x16x32xf32> to vector<16x32xf32>
    %14 = vector.shape_cast %11 : vector<16x32xf32> to vector<1x16x32xf32>
    tpu.vector_store %arg7[%c0_10, %c0_11, %c0_12], %14 {strides = array<i32>} : memref<1x16x32xf32, #tpu.memory_space<vmem>>, vector<1x16x32xf32>,
    return
  }
  func.func @transform_0(%arg0: i32, %arg1: i32, %arg2: i32) -> (i32, i32) {
    %c0_i32 = arith.constant 0 : i32
    %c0_i32_0 = arith.constant 0 : i32
    return %arg0, %c0_i32 : i32, i32
  }
  func.func @transform_1(%arg0: i32, %arg1: i32, %arg2: i32) -> (i32, i32, i32) {
    %c0_i32 = arith.constant 0 : i32
    %c0_i32_0 = arith.constant 0 : i32
    return %arg1, %c0_i32, %arg2 : i32, i32, i32
  }
  func.func @transform_2(%arg0: i32, %arg1: i32, %arg2: i32) -> (i32, i32, i32) {
    %c0_i32 = arith.constant 0 : i32
    %c0_i32_0 = arith.constant 0 : i32
    return %arg1, %c0_i32, %arg2 : i32, i32, i32
  }
  func.func @transform_3(%arg0: i32, %arg1: i32, %arg2: i32) -> (i32, i32, i32) {
    %c0_i32 = arith.constant 0 : i32
    return %arg1, %arg0, %arg2 : i32, i32, i32
  }
  func.func @transform_4(%arg0: i32, %arg1: i32, %arg2: i32) -> (i32, i32, i32) {
    %c0_i32 = arith.constant 0 : i32
    return %arg1, %arg0, %arg2 : i32, i32, i32
  }
}

module attributes {stable_mosaic.version = 11 : i64} {
  func.func @_flash_attn_kernel(%arg0: i32, %arg1: i32, %arg2: i32, %arg3: memref<1x8x32xf32, #tpu.memory_space<vmem>>, %arg4: memref<1x8x32xf32, #tpu.memory_space<vmem>>, %arg5: memref<1x8x32xf32, #tpu.memory_space<vmem>>, %arg6: memref<8x32xf32, #tpu.memory_space<vmem>>, %arg7: memref<4x8x1xf32, #tpu.memory_space<vmem>>, %arg8: memref<4x8x1xf32, #tpu.memory_space<vmem>>, %arg9: memref<4x8x8xf32, #tpu.memory_space<vmem>>) attributes {dimension_semantics = [#tpu.dimension_semantics<parallel>, #tpu.dimension_semantics<parallel>, #tpu.dimension_semantics<arbitrary>], iteration_bounds = array<i64: 2, 1, 1>, scalar_prefetch = 0 : i64, scratch_operands = 3 : i64, tpu.core_type = #tpu.core_type<tc>, window_params = [{transform_indices = @transform_0, window_bounds = array<i64: 1, 8, 32>}, {transform_indices = @transform_1, window_bounds = array<i64: 1, 8, 32>}, {transform_indices = @transform_2, window_bounds = array<i64: 1, 8, 32>}, {transform_indices = @transform_3, window_bounds = array<i64: 8, 32>}]} {
    %c0_i32 = arith.constant 0 : i32
    %0 = arith.cmpi eq, %arg2, %c0_i32 : i32
    %1 = arith.extui %0 : i1 to i32
    %c0_i32_0 = arith.constant 0 : i32
    %2 = arith.cmpi ne, %1, %c0_i32_0 : i32
    scf.if %2 {
      %cst = arith.constant -1.000000e+30 : f32
      %20 = vector.broadcast %cst : f32 to vector<4x8x1xf32>
      %c0 = arith.constant 0 : index
      %c0_9 = arith.constant 0 : index
      %c0_10 = arith.constant 0 : index
      %21 = vector.load %arg7[%c0, %c0_9, %c0_10] : memref<4x8x1xf32, #tpu.memory_space<vmem>>, vector<4x8x1xf32>
      tpu.vector_store %arg7[%c0, %c0_9, %c0_10], %20 {strides = array<i32>} : memref<4x8x1xf32, #tpu.memory_space<vmem>>, vector<4x8x1xf32>,
      %cst_11 = arith.constant 0.000000e+00 : f32
      %22 = vector.broadcast %cst_11 : f32 to vector<4x8x1xf32>
      %c0_12 = arith.constant 0 : index
      %c0_13 = arith.constant 0 : index
      %c0_14 = arith.constant 0 : index
      %23 = vector.load %arg8[%c0_12, %c0_13, %c0_14] : memref<4x8x1xf32, #tpu.memory_space<vmem>>, vector<4x8x1xf32>
      tpu.vector_store %arg8[%c0_12, %c0_13, %c0_14], %22 {strides = array<i32>} : memref<4x8x1xf32, #tpu.memory_space<vmem>>, vector<4x8x1xf32>,
      %cst_15 = arith.constant 0.000000e+00 : f32
      %24 = vector.broadcast %cst_15 : f32 to vector<4x8x8xf32>
      %c0_16 = arith.constant 0 : index
      %c0_17 = arith.constant 0 : index
      %c0_18 = arith.constant 0 : index
      %25 = vector.load %arg9[%c0_16, %c0_17, %c0_18] : memref<4x8x8xf32, #tpu.memory_space<vmem>>, vector<4x8x8xf32>
      tpu.vector_store %arg9[%c0_16, %c0_17, %c0_18], %24 {strides = array<i32>} : memref<4x8x8xf32, #tpu.memory_space<vmem>>, vector<4x8x8xf32>,
    } else {
    }
    %c8_i32 = arith.constant 8 : i32
    %3 = arith.muli %arg1, %c8_i32 : i32
    %c8_i32_1 = arith.constant 8 : i32
    %4 = arith.muli %arg2, %c8_i32_1 : i32
    %c8_i32_2 = arith.constant 8 : i32
    %5 = arith.addi %3, %c8_i32_2 : i32
    %c1_i32 = arith.constant 1 : i32
    %6 = arith.subi %5, %c1_i32 : i32
    %c8_i32_3 = arith.constant 8 : i32
    %7 = arith.addi %4, %c8_i32_3 : i32
    %c1_i32_4 = arith.constant 1 : i32
    %8 = arith.subi %7, %c1_i32_4 : i32
    %9 = arith.cmpi sle, %8, %3 : i32
    %10 = arith.extui %9 : i1 to i32
    %c0_i32_5 = arith.constant 0 : i32
    %11 = arith.cmpi ne, %10, %c0_i32_5 : i32
    scf.if %11 {
      %c0 = arith.constant 0 : index
      %c0_9 = arith.constant 0 : index
      %c0_10 = arith.constant 0 : index
      %20 = vector.load %arg3[%c0, %c0_9, %c0_10] : memref<1x8x32xf32, #tpu.memory_space<vmem>>, vector<1x8x32xf32>
      %21 = vector.shape_cast %20 : vector<1x8x32xf32> to vector<8x32xf32>
      %cst = arith.constant 0.353553385 : f32
      %22 = vector.broadcast %cst : f32 to vector<8x32xf32>
      %23 = arith.mulf %21, %22 : vector<8x32xf32>
      %c0_11 = arith.constant 0 : index
      %c0_12 = arith.constant 0 : index
      %c0_13 = arith.constant 0 : index
      %24 = vector.load %arg4[%c0_11, %c0_12, %c0_13] : memref<1x8x32xf32, #tpu.memory_space<vmem>>, vector<1x8x32xf32>
      %25 = vector.shape_cast %24 : vector<1x8x32xf32> to vector<8x32xf32>
      %c0_14 = arith.constant 0 : index
      %c0_15 = arith.constant 0 : index
      %c0_16 = arith.constant 0 : index
      %26 = vector.load %arg5[%c0_14, %c0_15, %c0_16] : memref<1x8x32xf32, #tpu.memory_space<vmem>>, vector<1x8x32xf32>
      %27 = vector.shape_cast %26 : vector<1x8x32xf32> to vector<8x32xf32>
      %28 = vector.extract_strided_slice %23 {offsets = [0, 0], sizes = [8, 8], strides = [1, 1]} : vector<8x32xf32> to vector<8x8xf32>
      %29 = vector.extract_strided_slice %25 {offsets = [0, 0], sizes = [8, 8], strides = [1, 1]} : vector<8x32xf32> to vector<8x8xf32>
      %30 = vector.extract_strided_slice %27 {offsets = [0, 0], sizes = [8, 8], strides = [1, 1]} : vector<8x32xf32> to vector<8x8xf32>
      %cst_17 = arith.constant dense<0.000000e+00> : vector<8x8xf32>
      %31 = tpu.matmul %28, %29, %cst_17 {dimension_numbers = #tpu.dot_dimension_numbers<[1], [1], [0], [0], [0, 0, 1, 0], [], []>} : vector<8x8xf32>, vector<8x8xf32>, vector<8x8xf32> -> vector<8x8xf32>
      %c0_18 = arith.constant 0 : index
      %c0_19 = arith.constant 0 : index
      %c0_20 = arith.constant 0 : index
      %32 = vector.load %arg7[%c0_18, %c0_19, %c0_20] : memref<4x8x1xf32, #tpu.memory_space<vmem>>, vector<1x8x1xf32>
      %33 = vector.shape_cast %32 : vector<1x8x1xf32> to vector<8x1xf32>
      %cst_21 = arith.constant dense<0xFF800000> : vector<8xf32>
      %34 = vector.multi_reduction <maximumf>, %31, %cst_21 [1] : vector<8x8xf32> to vector<8xf32>
      %35 = vector.shape_cast %34 : vector<8xf32> to vector<8x1xf32>
      %36 = arith.maximumf %33, %35 : vector<8x1xf32>
      %37 = arith.subf %33, %36 : vector<8x1xf32>
      %38 = math.exp %37 : vector<8x1xf32>
      %39 = vector.broadcast %36 : vector<8x1xf32> to vector<8x8xf32>
      %40 = arith.subf %31, %39 : vector<8x8xf32>
      %41 = math.exp %40 : vector<8x8xf32>
      %c0_22 = arith.constant 0 : index
      %c0_23 = arith.constant 0 : index
      %c0_24 = arith.constant 0 : index
      %42 = vector.load %arg9[%c0_22, %c0_23, %c0_24] : memref<4x8x8xf32, #tpu.memory_space<vmem>>, vector<1x8x8xf32>
      %43 = vector.shape_cast %42 : vector<1x8x8xf32> to vector<8x8xf32>
      %44 = vector.broadcast %38 : vector<8x1xf32> to vector<8x8xf32>
      %45 = arith.mulf %43, %44 : vector<8x8xf32>
      %cst_25 = arith.constant dense<0.000000e+00> : vector<8x8xf32>
      %46 = tpu.matmul %41, %30, %cst_25 {dimension_numbers = #tpu.dot_dimension_numbers<[1], [0], [0], [1], [0, 0, 1, 1], [], []>} : vector<8x8xf32>, vector<8x8xf32>, vector<8x8xf32> -> vector<8x8xf32>
      %47 = arith.addf %45, %46 : vector<8x8xf32>
      %c0_26 = arith.constant 0 : index
      %c0_27 = arith.constant 0 : index
      %c0_28 = arith.constant 0 : index
      %48 = vector.load %arg9[%c0_26, %c0_27, %c0_28] : memref<4x8x8xf32, #tpu.memory_space<vmem>>, vector<1x8x8xf32>
      %49 = vector.shape_cast %48 : vector<1x8x8xf32> to vector<8x8xf32>
      %50 = vector.shape_cast %47 : vector<8x8xf32> to vector<1x8x8xf32>
      tpu.vector_store %arg9[%c0_26, %c0_27, %c0_28], %50 {strides = array<i32>} : memref<4x8x8xf32, #tpu.memory_space<vmem>>, vector<1x8x8xf32>,
      %c0_29 = arith.constant 0 : index
      %c0_30 = arith.constant 0 : index
      %c0_31 = arith.constant 0 : index
      %51 = vector.load %arg8[%c0_29, %c0_30, %c0_31] : memref<4x8x1xf32, #tpu.memory_space<vmem>>, vector<1x8x1xf32>
      %52 = vector.shape_cast %51 : vector<1x8x1xf32> to vector<8x1xf32>
      %53 = arith.mulf %52, %38 : vector<8x1xf32>
      %cst_32 = arith.constant dense<0.000000e+00> : vector<8xf32>
      %54 = vector.multi_reduction <add>, %41, %cst_32 [1] : vector<8x8xf32> to vector<8xf32>
      %55 = vector.shape_cast %54 : vector<8xf32> to vector<8x1xf32>
      %56 = arith.addf %53, %55 : vector<8x1xf32>
      %c0_33 = arith.constant 0 : index
      %c0_34 = arith.constant 0 : index
      %c0_35 = arith.constant 0 : index
      %57 = vector.load %arg8[%c0_33, %c0_34, %c0_35] : memref<4x8x1xf32, #tpu.memory_space<vmem>>, vector<1x8x1xf32>
      %58 = vector.shape_cast %57 : vector<1x8x1xf32> to vector<8x1xf32>
      %59 = vector.shape_cast %56 : vector<8x1xf32> to vector<1x8x1xf32>
      tpu.vector_store %arg8[%c0_33, %c0_34, %c0_35], %59 {strides = array<i32>} : memref<4x8x1xf32, #tpu.memory_space<vmem>>, vector<1x8x1xf32>,
      %c0_36 = arith.constant 0 : index
      %c0_37 = arith.constant 0 : index
      %c0_38 = arith.constant 0 : index
      %60 = vector.load %arg7[%c0_36, %c0_37, %c0_38] : memref<4x8x1xf32, #tpu.memory_space<vmem>>, vector<1x8x1xf32>
      %61 = vector.shape_cast %60 : vector<1x8x1xf32> to vector<8x1xf32>
      %62 = vector.shape_cast %36 : vector<8x1xf32> to vector<1x8x1xf32>
      tpu.vector_store %arg7[%c0_36, %c0_37, %c0_38], %62 {strides = array<i32>} : memref<4x8x1xf32, #tpu.memory_space<vmem>>, vector<1x8x1xf32>,
      %63 = vector.extract_strided_slice %23 {offsets = [0, 8], sizes = [8, 8], strides = [1, 1]} : vector<8x32xf32> to vector<8x8xf32>
      %64 = vector.extract_strided_slice %25 {offsets = [0, 8], sizes = [8, 8], strides = [1, 1]} : vector<8x32xf32> to vector<8x8xf32>
      %65 = vector.extract_strided_slice %27 {offsets = [0, 8], sizes = [8, 8], strides = [1, 1]} : vector<8x32xf32> to vector<8x8xf32>
      %cst_39 = arith.constant dense<0.000000e+00> : vector<8x8xf32>
      %66 = tpu.matmul %63, %64, %cst_39 {dimension_numbers = #tpu.dot_dimension_numbers<[1], [1], [0], [0], [0, 0, 1, 0], [], []>} : vector<8x8xf32>, vector<8x8xf32>, vector<8x8xf32> -> vector<8x8xf32>
      %c1 = arith.constant 1 : index
      %c0_40 = arith.constant 0 : index
      %c0_41 = arith.constant 0 : index
      %67 = vector.load %arg7[%c1, %c0_40, %c0_41] : memref<4x8x1xf32, #tpu.memory_space<vmem>>, vector<1x8x1xf32>
      %68 = vector.shape_cast %67 : vector<1x8x1xf32> to vector<8x1xf32>
      %cst_42 = arith.constant dense<0xFF800000> : vector<8xf32>
      %69 = vector.multi_reduction <maximumf>, %66, %cst_42 [1] : vector<8x8xf32> to vector<8xf32>
      %70 = vector.shape_cast %69 : vector<8xf32> to vector<8x1xf32>
      %71 = arith.maximumf %68, %70 : vector<8x1xf32>
      %72 = arith.subf %68, %71 : vector<8x1xf32>
      %73 = math.exp %72 : vector<8x1xf32>
      %74 = vector.broadcast %71 : vector<8x1xf32> to vector<8x8xf32>
      %75 = arith.subf %66, %74 : vector<8x8xf32>
      %76 = math.exp %75 : vector<8x8xf32>
      %c1_43 = arith.constant 1 : index
      %c0_44 = arith.constant 0 : index
      %c0_45 = arith.constant 0 : index
      %77 = vector.load %arg9[%c1_43, %c0_44, %c0_45] : memref<4x8x8xf32, #tpu.memory_space<vmem>>, vector<1x8x8xf32>
      %78 = vector.shape_cast %77 : vector<1x8x8xf32> to vector<8x8xf32>
      %79 = vector.broadcast %73 : vector<8x1xf32> to vector<8x8xf32>
      %80 = arith.mulf %78, %79 : vector<8x8xf32>
      %cst_46 = arith.constant dense<0.000000e+00> : vector<8x8xf32>
      %81 = tpu.matmul %76, %65, %cst_46 {dimension_numbers = #tpu.dot_dimension_numbers<[1], [0], [0], [1], [0, 0, 1, 1], [], []>} : vector<8x8xf32>, vector<8x8xf32>, vector<8x8xf32> -> vector<8x8xf32>
      %82 = arith.addf %80, %81 : vector<8x8xf32>
      %c1_47 = arith.constant 1 : index
      %c0_48 = arith.constant 0 : index
      %c0_49 = arith.constant 0 : index
      %83 = vector.load %arg9[%c1_47, %c0_48, %c0_49] : memref<4x8x8xf32, #tpu.memory_space<vmem>>, vector<1x8x8xf32>
      %84 = vector.shape_cast %83 : vector<1x8x8xf32> to vector<8x8xf32>
      %85 = vector.shape_cast %82 : vector<8x8xf32> to vector<1x8x8xf32>
      tpu.vector_store %arg9[%c1_47, %c0_48, %c0_49], %85 {strides = array<i32>} : memref<4x8x8xf32, #tpu.memory_space<vmem>>, vector<1x8x8xf32>,
      %c1_50 = arith.constant 1 : index
      %c0_51 = arith.constant 0 : index
      %c0_52 = arith.constant 0 : index
      %86 = vector.load %arg8[%c1_50, %c0_51, %c0_52] : memref<4x8x1xf32, #tpu.memory_space<vmem>>, vector<1x8x1xf32>
      %87 = vector.shape_cast %86 : vector<1x8x1xf32> to vector<8x1xf32>
      %88 = arith.mulf %87, %73 : vector<8x1xf32>
      %cst_53 = arith.constant dense<0.000000e+00> : vector<8xf32>
      %89 = vector.multi_reduction <add>, %76, %cst_53 [1] : vector<8x8xf32> to vector<8xf32>
      %90 = vector.shape_cast %89 : vector<8xf32> to vector<8x1xf32>
      %91 = arith.addf %88, %90 : vector<8x1xf32>
      %c1_54 = arith.constant 1 : index
      %c0_55 = arith.constant 0 : index
      %c0_56 = arith.constant 0 : index
      %92 = vector.load %arg8[%c1_54, %c0_55, %c0_56] : memref<4x8x1xf32, #tpu.memory_space<vmem>>, vector<1x8x1xf32>
      %93 = vector.shape_cast %92 : vector<1x8x1xf32> to vector<8x1xf32>
      %94 = vector.shape_cast %91 : vector<8x1xf32> to vector<1x8x1xf32>
      tpu.vector_store %arg8[%c1_54, %c0_55, %c0_56], %94 {strides = array<i32>} : memref<4x8x1xf32, #tpu.memory_space<vmem>>, vector<1x8x1xf32>,
      %c1_57 = arith.constant 1 : index
      %c0_58 = arith.constant 0 : index
      %c0_59 = arith.constant 0 : index
      %95 = vector.load %arg7[%c1_57, %c0_58, %c0_59] : memref<4x8x1xf32, #tpu.memory_space<vmem>>, vector<1x8x1xf32>
      %96 = vector.shape_cast %95 : vector<1x8x1xf32> to vector<8x1xf32>
      %97 = vector.shape_cast %71 : vector<8x1xf32> to vector<1x8x1xf32>
      tpu.vector_store %arg7[%c1_57, %c0_58, %c0_59], %97 {strides = array<i32>} : memref<4x8x1xf32, #tpu.memory_space<vmem>>, vector<1x8x1xf32>,
      %98 = vector.extract_strided_slice %23 {offsets = [0, 16], sizes = [8, 8], strides = [1, 1]} : vector<8x32xf32> to vector<8x8xf32>
      %99 = vector.extract_strided_slice %25 {offsets = [0, 16], sizes = [8, 8], strides = [1, 1]} : vector<8x32xf32> to vector<8x8xf32>
      %100 = vector.extract_strided_slice %27 {offsets = [0, 16], sizes = [8, 8], strides = [1, 1]} : vector<8x32xf32> to vector<8x8xf32>
      %cst_60 = arith.constant dense<0.000000e+00> : vector<8x8xf32>
      %101 = tpu.matmul %98, %99, %cst_60 {dimension_numbers = #tpu.dot_dimension_numbers<[1], [1], [0], [0], [0, 0, 1, 0], [], []>} : vector<8x8xf32>, vector<8x8xf32>, vector<8x8xf32> -> vector<8x8xf32>
      %c2 = arith.constant 2 : index
      %c0_61 = arith.constant 0 : index
      %c0_62 = arith.constant 0 : index
      %102 = vector.load %arg7[%c2, %c0_61, %c0_62] : memref<4x8x1xf32, #tpu.memory_space<vmem>>, vector<1x8x1xf32>
      %103 = vector.shape_cast %102 : vector<1x8x1xf32> to vector<8x1xf32>
      %cst_63 = arith.constant dense<0xFF800000> : vector<8xf32>
      %104 = vector.multi_reduction <maximumf>, %101, %cst_63 [1] : vector<8x8xf32> to vector<8xf32>
      %105 = vector.shape_cast %104 : vector<8xf32> to vector<8x1xf32>
      %106 = arith.maximumf %103, %105 : vector<8x1xf32>
      %107 = arith.subf %103, %106 : vector<8x1xf32>
      %108 = math.exp %107 : vector<8x1xf32>
      %109 = vector.broadcast %106 : vector<8x1xf32> to vector<8x8xf32>
      %110 = arith.subf %101, %109 : vector<8x8xf32>
      %111 = math.exp %110 : vector<8x8xf32>
      %c2_64 = arith.constant 2 : index
      %c0_65 = arith.constant 0 : index
      %c0_66 = arith.constant 0 : index
      %112 = vector.load %arg9[%c2_64, %c0_65, %c0_66] : memref<4x8x8xf32, #tpu.memory_space<vmem>>, vector<1x8x8xf32>
      %113 = vector.shape_cast %112 : vector<1x8x8xf32> to vector<8x8xf32>
      %114 = vector.broadcast %108 : vector<8x1xf32> to vector<8x8xf32>
      %115 = arith.mulf %113, %114 : vector<8x8xf32>
      %cst_67 = arith.constant dense<0.000000e+00> : vector<8x8xf32>
      %116 = tpu.matmul %111, %100, %cst_67 {dimension_numbers = #tpu.dot_dimension_numbers<[1], [0], [0], [1], [0, 0, 1, 1], [], []>} : vector<8x8xf32>, vector<8x8xf32>, vector<8x8xf32> -> vector<8x8xf32>
      %117 = arith.addf %115, %116 : vector<8x8xf32>
      %c2_68 = arith.constant 2 : index
      %c0_69 = arith.constant 0 : index
      %c0_70 = arith.constant 0 : index
      %118 = vector.load %arg9[%c2_68, %c0_69, %c0_70] : memref<4x8x8xf32, #tpu.memory_space<vmem>>, vector<1x8x8xf32>
      %119 = vector.shape_cast %118 : vector<1x8x8xf32> to vector<8x8xf32>
      %120 = vector.shape_cast %117 : vector<8x8xf32> to vector<1x8x8xf32>
      tpu.vector_store %arg9[%c2_68, %c0_69, %c0_70], %120 {strides = array<i32>} : memref<4x8x8xf32, #tpu.memory_space<vmem>>, vector<1x8x8xf32>,
      %c2_71 = arith.constant 2 : index
      %c0_72 = arith.constant 0 : index
      %c0_73 = arith.constant 0 : index
      %121 = vector.load %arg8[%c2_71, %c0_72, %c0_73] : memref<4x8x1xf32, #tpu.memory_space<vmem>>, vector<1x8x1xf32>
      %122 = vector.shape_cast %121 : vector<1x8x1xf32> to vector<8x1xf32>
      %123 = arith.mulf %122, %108 : vector<8x1xf32>
      %cst_74 = arith.constant dense<0.000000e+00> : vector<8xf32>
      %124 = vector.multi_reduction <add>, %111, %cst_74 [1] : vector<8x8xf32> to vector<8xf32>
      %125 = vector.shape_cast %124 : vector<8xf32> to vector<8x1xf32>
      %126 = arith.addf %123, %125 : vector<8x1xf32>
      %c2_75 = arith.constant 2 : index
      %c0_76 = arith.constant 0 : index
      %c0_77 = arith.constant 0 : index
      %127 = vector.load %arg8[%c2_75, %c0_76, %c0_77] : memref<4x8x1xf32, #tpu.memory_space<vmem>>, vector<1x8x1xf32>
      %128 = vector.shape_cast %127 : vector<1x8x1xf32> to vector<8x1xf32>
      %129 = vector.shape_cast %126 : vector<8x1xf32> to vector<1x8x1xf32>
      tpu.vector_store %arg8[%c2_75, %c0_76, %c0_77], %129 {strides = array<i32>} : memref<4x8x1xf32, #tpu.memory_space<vmem>>, vector<1x8x1xf32>,
      %c2_78 = arith.constant 2 : index
      %c0_79 = arith.constant 0 : index
      %c0_80 = arith.constant 0 : index
      %130 = vector.load %arg7[%c2_78, %c0_79, %c0_80] : memref<4x8x1xf32, #tpu.memory_space<vmem>>, vector<1x8x1xf32>
      %131 = vector.shape_cast %130 : vector<1x8x1xf32> to vector<8x1xf32>
      %132 = vector.shape_cast %106 : vector<8x1xf32> to vector<1x8x1xf32>
      tpu.vector_store %arg7[%c2_78, %c0_79, %c0_80], %132 {strides = array<i32>} : memref<4x8x1xf32, #tpu.memory_space<vmem>>, vector<1x8x1xf32>,
      %133 = vector.extract_strided_slice %23 {offsets = [0, 24], sizes = [8, 8], strides = [1, 1]} : vector<8x32xf32> to vector<8x8xf32>
      %134 = vector.extract_strided_slice %25 {offsets = [0, 24], sizes = [8, 8], strides = [1, 1]} : vector<8x32xf32> to vector<8x8xf32>
      %135 = vector.extract_strided_slice %27 {offsets = [0, 24], sizes = [8, 8], strides = [1, 1]} : vector<8x32xf32> to vector<8x8xf32>
      %cst_81 = arith.constant dense<0.000000e+00> : vector<8x8xf32>
      %136 = tpu.matmul %133, %134, %cst_81 {dimension_numbers = #tpu.dot_dimension_numbers<[1], [1], [0], [0], [0, 0, 1, 0], [], []>} : vector<8x8xf32>, vector<8x8xf32>, vector<8x8xf32> -> vector<8x8xf32>
      %c3 = arith.constant 3 : index
      %c0_82 = arith.constant 0 : index
      %c0_83 = arith.constant 0 : index
      %137 = vector.load %arg7[%c3, %c0_82, %c0_83] : memref<4x8x1xf32, #tpu.memory_space<vmem>>, vector<1x8x1xf32>
      %138 = vector.shape_cast %137 : vector<1x8x1xf32> to vector<8x1xf32>
      %cst_84 = arith.constant dense<0xFF800000> : vector<8xf32>
      %139 = vector.multi_reduction <maximumf>, %136, %cst_84 [1] : vector<8x8xf32> to vector<8xf32>
      %140 = vector.shape_cast %139 : vector<8xf32> to vector<8x1xf32>
      %141 = arith.maximumf %138, %140 : vector<8x1xf32>
      %142 = arith.subf %138, %141 : vector<8x1xf32>
      %143 = math.exp %142 : vector<8x1xf32>
      %144 = vector.broadcast %141 : vector<8x1xf32> to vector<8x8xf32>
      %145 = arith.subf %136, %144 : vector<8x8xf32>
      %146 = math.exp %145 : vector<8x8xf32>
      %c3_85 = arith.constant 3 : index
      %c0_86 = arith.constant 0 : index
      %c0_87 = arith.constant 0 : index
      %147 = vector.load %arg9[%c3_85, %c0_86, %c0_87] : memref<4x8x8xf32, #tpu.memory_space<vmem>>, vector<1x8x8xf32>
      %148 = vector.shape_cast %147 : vector<1x8x8xf32> to vector<8x8xf32>
      %149 = vector.broadcast %143 : vector<8x1xf32> to vector<8x8xf32>
      %150 = arith.mulf %148, %149 : vector<8x8xf32>
      %cst_88 = arith.constant dense<0.000000e+00> : vector<8x8xf32>
      %151 = tpu.matmul %146, %135, %cst_88 {dimension_numbers = #tpu.dot_dimension_numbers<[1], [0], [0], [1], [0, 0, 1, 1], [], []>} : vector<8x8xf32>, vector<8x8xf32>, vector<8x8xf32> -> vector<8x8xf32>
      %152 = arith.addf %150, %151 : vector<8x8xf32>
      %c3_89 = arith.constant 3 : index
      %c0_90 = arith.constant 0 : index
      %c0_91 = arith.constant 0 : index
      %153 = vector.load %arg9[%c3_89, %c0_90, %c0_91] : memref<4x8x8xf32, #tpu.memory_space<vmem>>, vector<1x8x8xf32>
      %154 = vector.shape_cast %153 : vector<1x8x8xf32> to vector<8x8xf32>
      %155 = vector.shape_cast %152 : vector<8x8xf32> to vector<1x8x8xf32>
      tpu.vector_store %arg9[%c3_89, %c0_90, %c0_91], %155 {strides = array<i32>} : memref<4x8x8xf32, #tpu.memory_space<vmem>>, vector<1x8x8xf32>,
      %c3_92 = arith.constant 3 : index
      %c0_93 = arith.constant 0 : index
      %c0_94 = arith.constant 0 : index
      %156 = vector.load %arg8[%c3_92, %c0_93, %c0_94] : memref<4x8x1xf32, #tpu.memory_space<vmem>>, vector<1x8x1xf32>
      %157 = vector.shape_cast %156 : vector<1x8x1xf32> to vector<8x1xf32>
      %158 = arith.mulf %157, %143 : vector<8x1xf32>
      %cst_95 = arith.constant dense<0.000000e+00> : vector<8xf32>
      %159 = vector.multi_reduction <add>, %146, %cst_95 [1] : vector<8x8xf32> to vector<8xf32>
      %160 = vector.shape_cast %159 : vector<8xf32> to vector<8x1xf32>
      %161 = arith.addf %158, %160 : vector<8x1xf32>
      %c3_96 = arith.constant 3 : index
      %c0_97 = arith.constant 0 : index
      %c0_98 = arith.constant 0 : index
      %162 = vector.load %arg8[%c3_96, %c0_97, %c0_98] : memref<4x8x1xf32, #tpu.memory_space<vmem>>, vector<1x8x1xf32>
      %163 = vector.shape_cast %162 : vector<1x8x1xf32> to vector<8x1xf32>
      %164 = vector.shape_cast %161 : vector<8x1xf32> to vector<1x8x1xf32>
      tpu.vector_store %arg8[%c3_96, %c0_97, %c0_98], %164 {strides = array<i32>} : memref<4x8x1xf32, #tpu.memory_space<vmem>>, vector<1x8x1xf32>,
      %c3_99 = arith.constant 3 : index
      %c0_100 = arith.constant 0 : index
      %c0_101 = arith.constant 0 : index
      %165 = vector.load %arg7[%c3_99, %c0_100, %c0_101] : memref<4x8x1xf32, #tpu.memory_space<vmem>>, vector<1x8x1xf32>
      %166 = vector.shape_cast %165 : vector<1x8x1xf32> to vector<8x1xf32>
      %167 = vector.shape_cast %141 : vector<8x1xf32> to vector<1x8x1xf32>
      tpu.vector_store %arg7[%c3_99, %c0_100, %c0_101], %167 {strides = array<i32>} : memref<4x8x1xf32, #tpu.memory_space<vmem>>, vector<1x8x1xf32>,
    } else {
    }
    %12 = arith.cmpi sgt, %8, %3 : i32
    %13 = arith.cmpi sle, %4, %6 : i32
    %14 = arith.andi %12, %13 : i1
    %15 = arith.extui %14 : i1 to i32
    %c0_i32_6 = arith.constant 0 : i32
    %16 = arith.cmpi ne, %15, %c0_i32_6 : i32
    scf.if %16 {
      %c0 = arith.constant 0 : index
      %c0_9 = arith.constant 0 : index
      %c0_10 = arith.constant 0 : index
      %20 = vector.load %arg3[%c0, %c0_9, %c0_10] : memref<1x8x32xf32, #tpu.memory_space<vmem>>, vector<1x8x32xf32>
      %21 = vector.shape_cast %20 : vector<1x8x32xf32> to vector<8x32xf32>
      %cst = arith.constant 0.353553385 : f32
      %22 = vector.broadcast %cst : f32 to vector<8x32xf32>
      %23 = arith.mulf %21, %22 : vector<8x32xf32>
      %c0_11 = arith.constant 0 : index
      %c0_12 = arith.constant 0 : index
      %c0_13 = arith.constant 0 : index
      %24 = vector.load %arg4[%c0_11, %c0_12, %c0_13] : memref<1x8x32xf32, #tpu.memory_space<vmem>>, vector<1x8x32xf32>
      %25 = vector.shape_cast %24 : vector<1x8x32xf32> to vector<8x32xf32>
      %c0_14 = arith.constant 0 : index
      %c0_15 = arith.constant 0 : index
      %c0_16 = arith.constant 0 : index
      %26 = vector.load %arg5[%c0_14, %c0_15, %c0_16] : memref<1x8x32xf32, #tpu.memory_space<vmem>>, vector<1x8x32xf32>
      %27 = vector.shape_cast %26 : vector<1x8x32xf32> to vector<8x32xf32>
      %28 = tpu.iota {dimensions = array<i32: 0>} : vector<8x8xi32>
      %29 = vector.broadcast %3 : i32 to vector<8x8xi32>
      %30 = arith.addi %29, %28 : vector<8x8xi32>
      %31 = tpu.iota {dimensions = array<i32: 1>} : vector<8x8xi32>
      %32 = vector.broadcast %4 : i32 to vector<8x8xi32>
      %33 = arith.addi %32, %31 : vector<8x8xi32>
      %34 = arith.cmpi sgt, %33, %30 : vector<8x8xi32>
      %35 = vector.extract_strided_slice %23 {offsets = [0, 0], sizes = [8, 8], strides = [1, 1]} : vector<8x32xf32> to vector<8x8xf32>
      %36 = vector.extract_strided_slice %25 {offsets = [0, 0], sizes = [8, 8], strides = [1, 1]} : vector<8x32xf32> to vector<8x8xf32>
      %37 = vector.extract_strided_slice %27 {offsets = [0, 0], sizes = [8, 8], strides = [1, 1]} : vector<8x32xf32> to vector<8x8xf32>
      %cst_17 = arith.constant dense<0.000000e+00> : vector<8x8xf32>
      %38 = tpu.matmul %35, %36, %cst_17 {dimension_numbers = #tpu.dot_dimension_numbers<[1], [1], [0], [0], [0, 0, 1, 0], [], []>} : vector<8x8xf32>, vector<8x8xf32>, vector<8x8xf32> -> vector<8x8xf32>
      %cst_18 = arith.constant -1.000000e+30 : f32
      %39 = vector.broadcast %cst_18 : f32 to vector<8x8xf32>
      %40 = arith.select %34, %39, %38 : vector<8x8xi1>, vector<8x8xf32>
      %c0_19 = arith.constant 0 : index
      %c0_20 = arith.constant 0 : index
      %c0_21 = arith.constant 0 : index
      %41 = vector.load %arg7[%c0_19, %c0_20, %c0_21] : memref<4x8x1xf32, #tpu.memory_space<vmem>>, vector<1x8x1xf32>
      %42 = vector.shape_cast %41 : vector<1x8x1xf32> to vector<8x1xf32>
      %cst_22 = arith.constant dense<0xFF800000> : vector<8xf32>
      %43 = vector.multi_reduction <maximumf>, %40, %cst_22 [1] : vector<8x8xf32> to vector<8xf32>
      %44 = vector.shape_cast %43 : vector<8xf32> to vector<8x1xf32>
      %45 = arith.maximumf %42, %44 : vector<8x1xf32>
      %46 = arith.subf %42, %45 : vector<8x1xf32>
      %47 = math.exp %46 : vector<8x1xf32>
      %48 = vector.broadcast %45 : vector<8x1xf32> to vector<8x8xf32>
      %49 = arith.subf %40, %48 : vector<8x8xf32>
      %50 = math.exp %49 : vector<8x8xf32>
      %c0_23 = arith.constant 0 : index
      %c0_24 = arith.constant 0 : index
      %c0_25 = arith.constant 0 : index
      %51 = vector.load %arg9[%c0_23, %c0_24, %c0_25] : memref<4x8x8xf32, #tpu.memory_space<vmem>>, vector<1x8x8xf32>
      %52 = vector.shape_cast %51 : vector<1x8x8xf32> to vector<8x8xf32>
      %53 = vector.broadcast %47 : vector<8x1xf32> to vector<8x8xf32>
      %54 = arith.mulf %52, %53 : vector<8x8xf32>
      %cst_26 = arith.constant dense<0.000000e+00> : vector<8x8xf32>
      %55 = tpu.matmul %50, %37, %cst_26 {dimension_numbers = #tpu.dot_dimension_numbers<[1], [0], [0], [1], [0, 0, 1, 1], [], []>} : vector<8x8xf32>, vector<8x8xf32>, vector<8x8xf32> -> vector<8x8xf32>
      %56 = arith.addf %54, %55 : vector<8x8xf32>
      %c0_27 = arith.constant 0 : index
      %c0_28 = arith.constant 0 : index
      %c0_29 = arith.constant 0 : index
      %57 = vector.load %arg9[%c0_27, %c0_28, %c0_29] : memref<4x8x8xf32, #tpu.memory_space<vmem>>, vector<1x8x8xf32>
      %58 = vector.shape_cast %57 : vector<1x8x8xf32> to vector<8x8xf32>
      %59 = vector.shape_cast %56 : vector<8x8xf32> to vector<1x8x8xf32>
      tpu.vector_store %arg9[%c0_27, %c0_28, %c0_29], %59 {strides = array<i32>} : memref<4x8x8xf32, #tpu.memory_space<vmem>>, vector<1x8x8xf32>,
      %c0_30 = arith.constant 0 : index
      %c0_31 = arith.constant 0 : index
      %c0_32 = arith.constant 0 : index
      %60 = vector.load %arg8[%c0_30, %c0_31, %c0_32] : memref<4x8x1xf32, #tpu.memory_space<vmem>>, vector<1x8x1xf32>
      %61 = vector.shape_cast %60 : vector<1x8x1xf32> to vector<8x1xf32>
      %62 = arith.mulf %61, %47 : vector<8x1xf32>
      %cst_33 = arith.constant dense<0.000000e+00> : vector<8xf32>
      %63 = vector.multi_reduction <add>, %50, %cst_33 [1] : vector<8x8xf32> to vector<8xf32>
      %64 = vector.shape_cast %63 : vector<8xf32> to vector<8x1xf32>
      %65 = arith.addf %62, %64 : vector<8x1xf32>
      %c0_34 = arith.constant 0 : index
      %c0_35 = arith.constant 0 : index
      %c0_36 = arith.constant 0 : index
      %66 = vector.load %arg8[%c0_34, %c0_35, %c0_36] : memref<4x8x1xf32, #tpu.memory_space<vmem>>, vector<1x8x1xf32>
      %67 = vector.shape_cast %66 : vector<1x8x1xf32> to vector<8x1xf32>
      %68 = vector.shape_cast %65 : vector<8x1xf32> to vector<1x8x1xf32>
      tpu.vector_store %arg8[%c0_34, %c0_35, %c0_36], %68 {strides = array<i32>} : memref<4x8x1xf32, #tpu.memory_space<vmem>>, vector<1x8x1xf32>,
      %c0_37 = arith.constant 0 : index
      %c0_38 = arith.constant 0 : index
      %c0_39 = arith.constant 0 : index
      %69 = vector.load %arg7[%c0_37, %c0_38, %c0_39] : memref<4x8x1xf32, #tpu.memory_space<vmem>>, vector<1x8x1xf32>
      %70 = vector.shape_cast %69 : vector<1x8x1xf32> to vector<8x1xf32>
      %71 = vector.shape_cast %45 : vector<8x1xf32> to vector<1x8x1xf32>
      tpu.vector_store %arg7[%c0_37, %c0_38, %c0_39], %71 {strides = array<i32>} : memref<4x8x1xf32, #tpu.memory_space<vmem>>, vector<1x8x1xf32>,
      %72 = vector.extract_strided_slice %23 {offsets = [0, 8], sizes = [8, 8], strides = [1, 1]} : vector<8x32xf32> to vector<8x8xf32>
      %73 = vector.extract_strided_slice %25 {offsets = [0, 8], sizes = [8, 8], strides = [1, 1]} : vector<8x32xf32> to vector<8x8xf32>
      %74 = vector.extract_strided_slice %27 {offsets = [0, 8], sizes = [8, 8], strides = [1, 1]} : vector<8x32xf32> to vector<8x8xf32>
      %cst_40 = arith.constant dense<0.000000e+00> : vector<8x8xf32>
      %75 = tpu.matmul %72, %73, %cst_40 {dimension_numbers = #tpu.dot_dimension_numbers<[1], [1], [0], [0], [0, 0, 1, 0], [], []>} : vector<8x8xf32>, vector<8x8xf32>, vector<8x8xf32> -> vector<8x8xf32>
      %cst_41 = arith.constant -1.000000e+30 : f32
      %76 = vector.broadcast %cst_41 : f32 to vector<8x8xf32>
      %77 = arith.select %34, %76, %75 : vector<8x8xi1>, vector<8x8xf32>
      %c1 = arith.constant 1 : index
      %c0_42 = arith.constant 0 : index
      %c0_43 = arith.constant 0 : index
      %78 = vector.load %arg7[%c1, %c0_42, %c0_43] : memref<4x8x1xf32, #tpu.memory_space<vmem>>, vector<1x8x1xf32>
      %79 = vector.shape_cast %78 : vector<1x8x1xf32> to vector<8x1xf32>
      %cst_44 = arith.constant dense<0xFF800000> : vector<8xf32>
      %80 = vector.multi_reduction <maximumf>, %77, %cst_44 [1] : vector<8x8xf32> to vector<8xf32>
      %81 = vector.shape_cast %80 : vector<8xf32> to vector<8x1xf32>
      %82 = arith.maximumf %79, %81 : vector<8x1xf32>
      %83 = arith.subf %79, %82 : vector<8x1xf32>
      %84 = math.exp %83 : vector<8x1xf32>
      %85 = vector.broadcast %82 : vector<8x1xf32> to vector<8x8xf32>
      %86 = arith.subf %77, %85 : vector<8x8xf32>
      %87 = math.exp %86 : vector<8x8xf32>
      %c1_45 = arith.constant 1 : index
      %c0_46 = arith.constant 0 : index
      %c0_47 = arith.constant 0 : index
      %88 = vector.load %arg9[%c1_45, %c0_46, %c0_47] : memref<4x8x8xf32, #tpu.memory_space<vmem>>, vector<1x8x8xf32>
      %89 = vector.shape_cast %88 : vector<1x8x8xf32> to vector<8x8xf32>
      %90 = vector.broadcast %84 : vector<8x1xf32> to vector<8x8xf32>
      %91 = arith.mulf %89, %90 : vector<8x8xf32>
      %cst_48 = arith.constant dense<0.000000e+00> : vector<8x8xf32>
      %92 = tpu.matmul %87, %74, %cst_48 {dimension_numbers = #tpu.dot_dimension_numbers<[1], [0], [0], [1], [0, 0, 1, 1], [], []>} : vector<8x8xf32>, vector<8x8xf32>, vector<8x8xf32> -> vector<8x8xf32>
      %93 = arith.addf %91, %92 : vector<8x8xf32>
      %c1_49 = arith.constant 1 : index
      %c0_50 = arith.constant 0 : index
      %c0_51 = arith.constant 0 : index
      %94 = vector.load %arg9[%c1_49, %c0_50, %c0_51] : memref<4x8x8xf32, #tpu.memory_space<vmem>>, vector<1x8x8xf32>
      %95 = vector.shape_cast %94 : vector<1x8x8xf32> to vector<8x8xf32>
      %96 = vector.shape_cast %93 : vector<8x8xf32> to vector<1x8x8xf32>
      tpu.vector_store %arg9[%c1_49, %c0_50, %c0_51], %96 {strides = array<i32>} : memref<4x8x8xf32, #tpu.memory_space<vmem>>, vector<1x8x8xf32>,
      %c1_52 = arith.constant 1 : index
      %c0_53 = arith.constant 0 : index
      %c0_54 = arith.constant 0 : index
      %97 = vector.load %arg8[%c1_52, %c0_53, %c0_54] : memref<4x8x1xf32, #tpu.memory_space<vmem>>, vector<1x8x1xf32>
      %98 = vector.shape_cast %97 : vector<1x8x1xf32> to vector<8x1xf32>
      %99 = arith.mulf %98, %84 : vector<8x1xf32>
      %cst_55 = arith.constant dense<0.000000e+00> : vector<8xf32>
      %100 = vector.multi_reduction <add>, %87, %cst_55 [1] : vector<8x8xf32> to vector<8xf32>
      %101 = vector.shape_cast %100 : vector<8xf32> to vector<8x1xf32>
      %102 = arith.addf %99, %101 : vector<8x1xf32>
      %c1_56 = arith.constant 1 : index
      %c0_57 = arith.constant 0 : index
      %c0_58 = arith.constant 0 : index
      %103 = vector.load %arg8[%c1_56, %c0_57, %c0_58] : memref<4x8x1xf32, #tpu.memory_space<vmem>>, vector<1x8x1xf32>
      %104 = vector.shape_cast %103 : vector<1x8x1xf32> to vector<8x1xf32>
      %105 = vector.shape_cast %102 : vector<8x1xf32> to vector<1x8x1xf32>
      tpu.vector_store %arg8[%c1_56, %c0_57, %c0_58], %105 {strides = array<i32>} : memref<4x8x1xf32, #tpu.memory_space<vmem>>, vector<1x8x1xf32>,
      %c1_59 = arith.constant 1 : index
      %c0_60 = arith.constant 0 : index
      %c0_61 = arith.constant 0 : index
      %106 = vector.load %arg7[%c1_59, %c0_60, %c0_61] : memref<4x8x1xf32, #tpu.memory_space<vmem>>, vector<1x8x1xf32>
      %107 = vector.shape_cast %106 : vector<1x8x1xf32> to vector<8x1xf32>
      %108 = vector.shape_cast %82 : vector<8x1xf32> to vector<1x8x1xf32>
      tpu.vector_store %arg7[%c1_59, %c0_60, %c0_61], %108 {strides = array<i32>} : memref<4x8x1xf32, #tpu.memory_space<vmem>>, vector<1x8x1xf32>,
      %109 = vector.extract_strided_slice %23 {offsets = [0, 16], sizes = [8, 8], strides = [1, 1]} : vector<8x32xf32> to vector<8x8xf32>
      %110 = vector.extract_strided_slice %25 {offsets = [0, 16], sizes = [8, 8], strides = [1, 1]} : vector<8x32xf32> to vector<8x8xf32>
      %111 = vector.extract_strided_slice %27 {offsets = [0, 16], sizes = [8, 8], strides = [1, 1]} : vector<8x32xf32> to vector<8x8xf32>
      %cst_62 = arith.constant dense<0.000000e+00> : vector<8x8xf32>
      %112 = tpu.matmul %109, %110, %cst_62 {dimension_numbers = #tpu.dot_dimension_numbers<[1], [1], [0], [0], [0, 0, 1, 0], [], []>} : vector<8x8xf32>, vector<8x8xf32>, vector<8x8xf32> -> vector<8x8xf32>
      %cst_63 = arith.constant -1.000000e+30 : f32
      %113 = vector.broadcast %cst_63 : f32 to vector<8x8xf32>
      %114 = arith.select %34, %113, %112 : vector<8x8xi1>, vector<8x8xf32>
      %c2 = arith.constant 2 : index
      %c0_64 = arith.constant 0 : index
      %c0_65 = arith.constant 0 : index
      %115 = vector.load %arg7[%c2, %c0_64, %c0_65] : memref<4x8x1xf32, #tpu.memory_space<vmem>>, vector<1x8x1xf32>
      %116 = vector.shape_cast %115 : vector<1x8x1xf32> to vector<8x1xf32>
      %cst_66 = arith.constant dense<0xFF800000> : vector<8xf32>
      %117 = vector.multi_reduction <maximumf>, %114, %cst_66 [1] : vector<8x8xf32> to vector<8xf32>
      %118 = vector.shape_cast %117 : vector<8xf32> to vector<8x1xf32>
      %119 = arith.maximumf %116, %118 : vector<8x1xf32>
      %120 = arith.subf %116, %119 : vector<8x1xf32>
      %121 = math.exp %120 : vector<8x1xf32>
      %122 = vector.broadcast %119 : vector<8x1xf32> to vector<8x8xf32>
      %123 = arith.subf %114, %122 : vector<8x8xf32>
      %124 = math.exp %123 : vector<8x8xf32>
      %c2_67 = arith.constant 2 : index
      %c0_68 = arith.constant 0 : index
      %c0_69 = arith.constant 0 : index
      %125 = vector.load %arg9[%c2_67, %c0_68, %c0_69] : memref<4x8x8xf32, #tpu.memory_space<vmem>>, vector<1x8x8xf32>
      %126 = vector.shape_cast %125 : vector<1x8x8xf32> to vector<8x8xf32>
      %127 = vector.broadcast %121 : vector<8x1xf32> to vector<8x8xf32>
      %128 = arith.mulf %126, %127 : vector<8x8xf32>
      %cst_70 = arith.constant dense<0.000000e+00> : vector<8x8xf32>
      %129 = tpu.matmul %124, %111, %cst_70 {dimension_numbers = #tpu.dot_dimension_numbers<[1], [0], [0], [1], [0, 0, 1, 1], [], []>} : vector<8x8xf32>, vector<8x8xf32>, vector<8x8xf32> -> vector<8x8xf32>
      %130 = arith.addf %128, %129 : vector<8x8xf32>
      %c2_71 = arith.constant 2 : index
      %c0_72 = arith.constant 0 : index
      %c0_73 = arith.constant 0 : index
      %131 = vector.load %arg9[%c2_71, %c0_72, %c0_73] : memref<4x8x8xf32, #tpu.memory_space<vmem>>, vector<1x8x8xf32>
      %132 = vector.shape_cast %131 : vector<1x8x8xf32> to vector<8x8xf32>
      %133 = vector.shape_cast %130 : vector<8x8xf32> to vector<1x8x8xf32>
      tpu.vector_store %arg9[%c2_71, %c0_72, %c0_73], %133 {strides = array<i32>} : memref<4x8x8xf32, #tpu.memory_space<vmem>>, vector<1x8x8xf32>,
      %c2_74 = arith.constant 2 : index
      %c0_75 = arith.constant 0 : index
      %c0_76 = arith.constant 0 : index
      %134 = vector.load %arg8[%c2_74, %c0_75, %c0_76] : memref<4x8x1xf32, #tpu.memory_space<vmem>>, vector<1x8x1xf32>
      %135 = vector.shape_cast %134 : vector<1x8x1xf32> to vector<8x1xf32>
      %136 = arith.mulf %135, %121 : vector<8x1xf32>
      %cst_77 = arith.constant dense<0.000000e+00> : vector<8xf32>
      %137 = vector.multi_reduction <add>, %124, %cst_77 [1] : vector<8x8xf32> to vector<8xf32>
      %138 = vector.shape_cast %137 : vector<8xf32> to vector<8x1xf32>
      %139 = arith.addf %136, %138 : vector<8x1xf32>
      %c2_78 = arith.constant 2 : index
      %c0_79 = arith.constant 0 : index
      %c0_80 = arith.constant 0 : index
      %140 = vector.load %arg8[%c2_78, %c0_79, %c0_80] : memref<4x8x1xf32, #tpu.memory_space<vmem>>, vector<1x8x1xf32>
      %141 = vector.shape_cast %140 : vector<1x8x1xf32> to vector<8x1xf32>
      %142 = vector.shape_cast %139 : vector<8x1xf32> to vector<1x8x1xf32>
      tpu.vector_store %arg8[%c2_78, %c0_79, %c0_80], %142 {strides = array<i32>} : memref<4x8x1xf32, #tpu.memory_space<vmem>>, vector<1x8x1xf32>,
      %c2_81 = arith.constant 2 : index
      %c0_82 = arith.constant 0 : index
      %c0_83 = arith.constant 0 : index
      %143 = vector.load %arg7[%c2_81, %c0_82, %c0_83] : memref<4x8x1xf32, #tpu.memory_space<vmem>>, vector<1x8x1xf32>
      %144 = vector.shape_cast %143 : vector<1x8x1xf32> to vector<8x1xf32>
      %145 = vector.shape_cast %119 : vector<8x1xf32> to vector<1x8x1xf32>
      tpu.vector_store %arg7[%c2_81, %c0_82, %c0_83], %145 {strides = array<i32>} : memref<4x8x1xf32, #tpu.memory_space<vmem>>, vector<1x8x1xf32>,
      %146 = vector.extract_strided_slice %23 {offsets = [0, 24], sizes = [8, 8], strides = [1, 1]} : vector<8x32xf32> to vector<8x8xf32>
      %147 = vector.extract_strided_slice %25 {offsets = [0, 24], sizes = [8, 8], strides = [1, 1]} : vector<8x32xf32> to vector<8x8xf32>
      %148 = vector.extract_strided_slice %27 {offsets = [0, 24], sizes = [8, 8], strides = [1, 1]} : vector<8x32xf32> to vector<8x8xf32>
      %cst_84 = arith.constant dense<0.000000e+00> : vector<8x8xf32>
      %149 = tpu.matmul %146, %147, %cst_84 {dimension_numbers = #tpu.dot_dimension_numbers<[1], [1], [0], [0], [0, 0, 1, 0], [], []>} : vector<8x8xf32>, vector<8x8xf32>, vector<8x8xf32> -> vector<8x8xf32>
      %cst_85 = arith.constant -1.000000e+30 : f32
      %150 = vector.broadcast %cst_85 : f32 to vector<8x8xf32>
      %151 = arith.select %34, %150, %149 : vector<8x8xi1>, vector<8x8xf32>
      %c3 = arith.constant 3 : index
      %c0_86 = arith.constant 0 : index
      %c0_87 = arith.constant 0 : index
      %152 = vector.load %arg7[%c3, %c0_86, %c0_87] : memref<4x8x1xf32, #tpu.memory_space<vmem>>, vector<1x8x1xf32>
      %153 = vector.shape_cast %152 : vector<1x8x1xf32> to vector<8x1xf32>
      %cst_88 = arith.constant dense<0xFF800000> : vector<8xf32>
      %154 = vector.multi_reduction <maximumf>, %151, %cst_88 [1] : vector<8x8xf32> to vector<8xf32>
      %155 = vector.shape_cast %154 : vector<8xf32> to vector<8x1xf32>
      %156 = arith.maximumf %153, %155 : vector<8x1xf32>
      %157 = arith.subf %153, %156 : vector<8x1xf32>
      %158 = math.exp %157 : vector<8x1xf32>
      %159 = vector.broadcast %156 : vector<8x1xf32> to vector<8x8xf32>
      %160 = arith.subf %151, %159 : vector<8x8xf32>
      %161 = math.exp %160 : vector<8x8xf32>
      %c3_89 = arith.constant 3 : index
      %c0_90 = arith.constant 0 : index
      %c0_91 = arith.constant 0 : index
      %162 = vector.load %arg9[%c3_89, %c0_90, %c0_91] : memref<4x8x8xf32, #tpu.memory_space<vmem>>, vector<1x8x8xf32>
      %163 = vector.shape_cast %162 : vector<1x8x8xf32> to vector<8x8xf32>
      %164 = vector.broadcast %158 : vector<8x1xf32> to vector<8x8xf32>
      %165 = arith.mulf %163, %164 : vector<8x8xf32>
      %cst_92 = arith.constant dense<0.000000e+00> : vector<8x8xf32>
      %166 = tpu.matmul %161, %148, %cst_92 {dimension_numbers = #tpu.dot_dimension_numbers<[1], [0], [0], [1], [0, 0, 1, 1], [], []>} : vector<8x8xf32>, vector<8x8xf32>, vector<8x8xf32> -> vector<8x8xf32>
      %167 = arith.addf %165, %166 : vector<8x8xf32>
      %c3_93 = arith.constant 3 : index
      %c0_94 = arith.constant 0 : index
      %c0_95 = arith.constant 0 : index
      %168 = vector.load %arg9[%c3_93, %c0_94, %c0_95] : memref<4x8x8xf32, #tpu.memory_space<vmem>>, vector<1x8x8xf32>
      %169 = vector.shape_cast %168 : vector<1x8x8xf32> to vector<8x8xf32>
      %170 = vector.shape_cast %167 : vector<8x8xf32> to vector<1x8x8xf32>
      tpu.vector_store %arg9[%c3_93, %c0_94, %c0_95], %170 {strides = array<i32>} : memref<4x8x8xf32, #tpu.memory_space<vmem>>, vector<1x8x8xf32>,
      %c3_96 = arith.constant 3 : index
      %c0_97 = arith.constant 0 : index
      %c0_98 = arith.constant 0 : index
      %171 = vector.load %arg8[%c3_96, %c0_97, %c0_98] : memref<4x8x1xf32, #tpu.memory_space<vmem>>, vector<1x8x1xf32>
      %172 = vector.shape_cast %171 : vector<1x8x1xf32> to vector<8x1xf32>
      %173 = arith.mulf %172, %158 : vector<8x1xf32>
      %cst_99 = arith.constant dense<0.000000e+00> : vector<8xf32>
      %174 = vector.multi_reduction <add>, %161, %cst_99 [1] : vector<8x8xf32> to vector<8xf32>
      %175 = vector.shape_cast %174 : vector<8xf32> to vector<8x1xf32>
      %176 = arith.addf %173, %175 : vector<8x1xf32>
      %c3_100 = arith.constant 3 : index
      %c0_101 = arith.constant 0 : index
      %c0_102 = arith.constant 0 : index
      %177 = vector.load %arg8[%c3_100, %c0_101, %c0_102] : memref<4x8x1xf32, #tpu.memory_space<vmem>>, vector<1x8x1xf32>
      %178 = vector.shape_cast %177 : vector<1x8x1xf32> to vector<8x1xf32>
      %179 = vector.shape_cast %176 : vector<8x1xf32> to vector<1x8x1xf32>
      tpu.vector_store %arg8[%c3_100, %c0_101, %c0_102], %179 {strides = array<i32>} : memref<4x8x1xf32, #tpu.memory_space<vmem>>, vector<1x8x1xf32>,
      %c3_103 = arith.constant 3 : index
      %c0_104 = arith.constant 0 : index
      %c0_105 = arith.constant 0 : index
      %180 = vector.load %arg7[%c3_103, %c0_104, %c0_105] : memref<4x8x1xf32, #tpu.memory_space<vmem>>, vector<1x8x1xf32>
      %181 = vector.shape_cast %180 : vector<1x8x1xf32> to vector<8x1xf32>
      %182 = vector.shape_cast %156 : vector<8x1xf32> to vector<1x8x1xf32>
      tpu.vector_store %arg7[%c3_103, %c0_104, %c0_105], %182 {strides = array<i32>} : memref<4x8x1xf32, #tpu.memory_space<vmem>>, vector<1x8x1xf32>,
    } else {
    }
    %c0_i32_7 = arith.constant 0 : i32
    %17 = arith.cmpi eq, %arg2, %c0_i32_7 : i32
    %18 = arith.extui %17 : i1 to i32
    %c0_i32_8 = arith.constant 0 : i32
    %19 = arith.cmpi ne, %18, %c0_i32_8 : i32
    scf.if %19 {
      %c0 = arith.constant 0 : index
      %c0_9 = arith.constant 0 : index
      %c0_10 = arith.constant 0 : index
      %20 = vector.load %arg9[%c0, %c0_9, %c0_10] : memref<4x8x8xf32, #tpu.memory_space<vmem>>, vector<1x8x8xf32>
      %21 = vector.shape_cast %20 : vector<1x8x8xf32> to vector<8x8xf32>
      %c0_11 = arith.constant 0 : index
      %c0_12 = arith.constant 0 : index
      %c0_13 = arith.constant 0 : index
      %22 = vector.load %arg8[%c0_11, %c0_12, %c0_13] : memref<4x8x1xf32, #tpu.memory_space<vmem>>, vector<1x8x1xf32>
      %23 = vector.shape_cast %22 : vector<1x8x1xf32> to vector<8x1xf32>
      %24 = tpu.reciprocal %23 : vector<8x1xf32> -> vector<8x1xf32>
      %25 = vector.broadcast %24 : vector<8x1xf32> to vector<8x8xf32>
      %26 = arith.mulf %21, %25 : vector<8x8xf32>
      %c0_14 = arith.constant 0 : index
      %c0_15 = arith.constant 0 : index
      %27 = vector.load %arg6[%c0_14, %c0_15] : memref<8x32xf32, #tpu.memory_space<vmem>>, vector<8x8xf32>
      tpu.vector_store %arg6[%c0_14, %c0_15], %26 {strides = array<i32>} : memref<8x32xf32, #tpu.memory_space<vmem>>, vector<8x8xf32>,
      %c1 = arith.constant 1 : index
      %c0_16 = arith.constant 0 : index
      %c0_17 = arith.constant 0 : index
      %28 = vector.load %arg9[%c1, %c0_16, %c0_17] : memref<4x8x8xf32, #tpu.memory_space<vmem>>, vector<1x8x8xf32>
      %29 = vector.shape_cast %28 : vector<1x8x8xf32> to vector<8x8xf32>
      %c1_18 = arith.constant 1 : index
      %c0_19 = arith.constant 0 : index
      %c0_20 = arith.constant 0 : index
      %30 = vector.load %arg8[%c1_18, %c0_19, %c0_20] : memref<4x8x1xf32, #tpu.memory_space<vmem>>, vector<1x8x1xf32>
      %31 = vector.shape_cast %30 : vector<1x8x1xf32> to vector<8x1xf32>
      %32 = tpu.reciprocal %31 : vector<8x1xf32> -> vector<8x1xf32>
      %33 = vector.broadcast %32 : vector<8x1xf32> to vector<8x8xf32>
      %34 = arith.mulf %29, %33 : vector<8x8xf32>
      %c0_21 = arith.constant 0 : index
      %c8 = arith.constant 8 : index
      %35 = vector.load %arg6[%c0_21, %c8] : memref<8x32xf32, #tpu.memory_space<vmem>>, vector<8x8xf32>
      tpu.vector_store %arg6[%c0_21, %c8], %34 {strides = array<i32>} : memref<8x32xf32, #tpu.memory_space<vmem>>, vector<8x8xf32>,
      %c2 = arith.constant 2 : index
      %c0_22 = arith.constant 0 : index
      %c0_23 = arith.constant 0 : index
      %36 = vector.load %arg9[%c2, %c0_22, %c0_23] : memref<4x8x8xf32, #tpu.memory_space<vmem>>, vector<1x8x8xf32>
      %37 = vector.shape_cast %36 : vector<1x8x8xf32> to vector<8x8xf32>
      %c2_24 = arith.constant 2 : index
      %c0_25 = arith.constant 0 : index
      %c0_26 = arith.constant 0 : index
      %38 = vector.load %arg8[%c2_24, %c0_25, %c0_26] : memref<4x8x1xf32, #tpu.memory_space<vmem>>, vector<1x8x1xf32>
      %39 = vector.shape_cast %38 : vector<1x8x1xf32> to vector<8x1xf32>
      %40 = tpu.reciprocal %39 : vector<8x1xf32> -> vector<8x1xf32>
      %41 = vector.broadcast %40 : vector<8x1xf32> to vector<8x8xf32>
      %42 = arith.mulf %37, %41 : vector<8x8xf32>
      %c0_27 = arith.constant 0 : index
      %c16 = arith.constant 16 : index
      %43 = vector.load %arg6[%c0_27, %c16] : memref<8x32xf32, #tpu.memory_space<vmem>>, vector<8x8xf32>
      tpu.vector_store %arg6[%c0_27, %c16], %42 {strides = array<i32>} : memref<8x32xf32, #tpu.memory_space<vmem>>, vector<8x8xf32>,
      %c3 = arith.constant 3 : index
      %c0_28 = arith.constant 0 : index
      %c0_29 = arith.constant 0 : index
      %44 = vector.load %arg9[%c3, %c0_28, %c0_29] : memref<4x8x8xf32, #tpu.memory_space<vmem>>, vector<1x8x8xf32>
      %45 = vector.shape_cast %44 : vector<1x8x8xf32> to vector<8x8xf32>
      %c3_30 = arith.constant 3 : index
      %c0_31 = arith.constant 0 : index
      %c0_32 = arith.constant 0 : index
      %46 = vector.load %arg8[%c3_30, %c0_31, %c0_32] : memref<4x8x1xf32, #tpu.memory_space<vmem>>, vector<1x8x1xf32>
      %47 = vector.shape_cast %46 : vector<1x8x1xf32> to vector<8x1xf32>
      %48 = tpu.reciprocal %47 : vector<8x1xf32> -> vector<8x1xf32>
      %49 = vector.broadcast %48 : vector<8x1xf32> to vector<8x8xf32>
      %50 = arith.mulf %45, %49 : vector<8x8xf32>
      %c0_33 = arith.constant 0 : index
      %c24 = arith.constant 24 : index
      %51 = vector.load %arg6[%c0_33, %c24] : memref<8x32xf32, #tpu.memory_space<vmem>>, vector<8x8xf32>
      tpu.vector_store %arg6[%c0_33, %c24], %50 {strides = array<i32>} : memref<8x32xf32, #tpu.memory_space<vmem>>, vector<8x8xf32>,
    } else {
    }
    return
  }
  func.func @transform_0(%arg0: i32, %arg1: i32, %arg2: i32) -> (i32, i32, i32) {
    %c1_i32 = arith.constant 1 : i32
    %0 = arith.muli %arg0, %c1_i32 : i32
    %1 = arith.addi %0, %arg1 : i32
    %c0_i32 = arith.constant 0 : i32
    %c0_i32_0 = arith.constant 0 : i32
    %c0_i32_1 = arith.constant 0 : i32
    return %c0_i32, %1, %c0_i32_0 : i32, i32, i32
  }
  func.func @transform_1(%arg0: i32, %arg1: i32, %arg2: i32) -> (i32, i32, i32) {
    %c1_i32 = arith.constant 1 : i32
    %0 = arith.muli %arg0, %c1_i32 : i32
    %1 = arith.addi %0, %arg2 : i32
    %c1_i32_0 = arith.constant 1 : i32
    %c0_i32 = arith.constant 0 : i32
    %c0_i32_1 = arith.constant 0 : i32
    return %c1_i32_0, %1, %c0_i32 : i32, i32, i32
  }
  func.func @transform_2(%arg0: i32, %arg1: i32, %arg2: i32) -> (i32, i32, i32) {
    %c1_i32 = arith.constant 1 : i32
    %0 = arith.muli %arg0, %c1_i32 : i32
    %1 = arith.addi %0, %arg2 : i32
    %c2_i32 = arith.constant 2 : i32
    %c0_i32 = arith.constant 0 : i32
    %c0_i32_0 = arith.constant 0 : i32
    return %c2_i32, %1, %c0_i32 : i32, i32, i32
  }
  func.func @transform_3(%arg0: i32, %arg1: i32, %arg2: i32) -> (i32, i32) {
    %c1_i32 = arith.constant 1 : i32
    %0 = arith.muli %arg0, %c1_i32 : i32
    %1 = arith.addi %0, %arg1 : i32
    %c0_i32 = arith.constant 0 : i32
    %c0_i32_0 = arith.constant 0 : i32
    return %1, %c0_i32 : i32, i32
  }
}

module attributes {stable_mosaic.version = 11 : i64} {
  func.func @kernel(%arg0: i32, %arg1: i32, %arg2: i32, %arg3: memref<16x128xf32, #tpu.memory_space<vmem>>, %arg4: memref<1x128x32xbf16, #tpu.memory_space<vmem>>, %arg5: memref<1x1x32xf32, #tpu.memory_space<vmem>>, %arg6: memref<1x16x32xf32, #tpu.memory_space<vmem>>, %arg7: memref<1x16x32xf32, #tpu.memory_space<vmem>>) attributes {dimension_semantics = [#tpu.dimension_semantics<parallel>, #tpu.dimension_semantics<parallel>, #tpu.dimension_semantics<parallel>], iteration_bounds = array<i64: 1, 1, 1>, scalar_prefetch = 0 : i64, scratch_operands = 0 : i64, tpu.core_type = #tpu.core_type<tc>, window_params = [{transform_indices = @transform_0, window_bounds = array<i64: 16, 128>}, {transform_indices = @transform_1, window_bounds = array<i64: 1, 128, 32>}, {transform_indices = @transform_2, window_bounds = array<i64: 1, 1, 32>}, {transform_indices = @transform_3, window_bounds = array<i64: 1, 16, 32>}, {transform_indices = @transform_4, window_bounds = array<i64: 1, 16, 32>}]} {
    %c0 = arith.constant 0 : index
    %c0_0 = arith.constant 0 : index
    %0 = vector.load %arg3[%c0, %c0_0] : memref<16x128xf32, #tpu.memory_space<vmem>>, vector<16x128xf32>
    %c0_1 = arith.constant 0 : index
    %c0_2 = arith.constant 0 : index
    %c0_3 = arith.constant 0 : index
    %1 = vector.load %arg4[%c0_1, %c0_2, %c0_3] : memref<1x128x32xbf16, #tpu.memory_space<vmem>>, vector<1x128x32xbf16>
    %2 = vector.shape_cast %1 : vector<1x128x32xbf16> to vector<128x32xbf16>
    %3 = arith.truncf %0 : vector<16x128xf32> to vector<16x128xbf16>
    %cst = arith.constant dense<0.000000e+00> : vector<16x32xf32>
    %4 = tpu.matmul %3, %2, %cst {dimension_numbers = #tpu.dot_dimension_numbers<[1], [0], [0], [1], [0, 0, 1, 1], [], []>} : vector<16x128xbf16>, vector<128x32xbf16>, vector<16x32xf32> -> vector<16x32xf32>
    %c0_4 = arith.constant 0 : index
    %c0_5 = arith.constant 0 : index
    %c0_6 = arith.constant 0 : index
    %5 = vector.load %arg5[%c0_4, %c0_5, %c0_6] : memref<1x1x32xf32, #tpu.memory_space<vmem>>, vector<1x1x32xf32>
    %6 = vector.shape_cast %5 : vector<1x1x32xf32> to vector<1x32xf32>
    %7 = vector.broadcast %6 : vector<1x32xf32> to vector<16x32xf32>
    %8 = arith.addf %4, %7 : vector<16x32xf32>
    %c0_7 = arith.constant 0 : index
    %c0_8 = arith.constant 0 : index
    %c0_9 = arith.constant 0 : index
    %9 = vector.load %arg6[%c0_7, %c0_8, %c0_9] : memref<1x16x32xf32, #tpu.memory_space<vmem>>, vector<1x16x32xf32>
    %10 = vector.shape_cast %9 : vector<1x16x32xf32> to vector<16x32xf32>
    %11 = arith.addf %8, %10 : vector<16x32xf32>
    %c0_10 = arith.constant 0 : index
    %c0_11 = arith.constant 0 : index
    %c0_12 = arith.constant 0 : index
    %12 = vector.load %arg7[%c0_10, %c0_11, %c0_12] : memref<1x16x32xf32, #tpu.memory_space<vmem>>, vector<1x16x32xf32>
    %13 = vector.shape_cast %12 : vector<1x16x32xf32> to vector<16x32xf32>
    %14 = vector.shape_cast %11 : vector<16x32xf32> to vector<1x16x32xf32>
    tpu.vector_store %arg7[%c0_10, %c0_11, %c0_12], %14 {strides = array<i32>} : memref<1x16x32xf32, #tpu.memory_space<vmem>>, vector<1x16x32xf32>,
    return
  }
  func.func @transform_0(%arg0: i32, %arg1: i32, %arg2: i32) -> (i32, i32) {
    %c0_i32 = arith.constant 0 : i32
    %c0_i32_0 = arith.constant 0 : i32
    return %arg0, %c0_i32 : i32, i32
  }
  func.func @transform_1(%arg0: i32, %arg1: i32, %arg2: i32) -> (i32, i32, i32) {
    %c0_i32 = arith.constant 0 : i32
    %c0_i32_0 = arith.constant 0 : i32
    return %arg1, %c0_i32, %arg2 : i32, i32, i32
  }
  func.func @transform_2(%arg0: i32, %arg1: i32, %arg2: i32) -> (i32, i32, i32) {
    %c0_i32 = arith.constant 0 : i32
    %c0_i32_0 = arith.constant 0 : i32
    return %arg1, %c0_i32, %arg2 : i32, i32, i32
  }
  func.func @transform_3(%arg0: i32, %arg1: i32, %arg2: i32) -> (i32, i32, i32) {
    %c0_i32 = arith.constant 0 : i32
    return %arg1, %arg0, %arg2 : i32, i32, i32
  }
  func.func @transform_4(%arg0: i32, %arg1: i32, %arg2: i32) -> (i32, i32, i32) {
    %c0_i32 = arith.constant 0 : i32
    return %arg1, %arg0, %arg2 : i32, i32, i32
  }
}

module attributes {stable_mosaic.version = 11 : i64} {
  func.func @kernel(%arg0: i32, %arg1: i32, %arg2: i32, %arg3: memref<16x32xf32, #tpu.memory_space<vmem>>, %arg4: memref<1x32xf32, #tpu.memory_space<vmem>>, %arg5: memref<1x32xf32, #tpu.memory_space<vmem>>, %arg6: memref<1x32x64xbf16, #tpu.memory_space<vmem>>, %arg7: memref<1x1x64xf32, #tpu.memory_space<vmem>>, %arg8: memref<1x16x64xf32, #tpu.memory_space<vmem>>) attributes {dimension_semantics = [#tpu.dimension_semantics<parallel>, #tpu.dimension_semantics<parallel>, #tpu.dimension_semantics<parallel>], iteration_bounds = array<i64: 1, 1, 1>, scalar_prefetch = 0 : i64, scratch_operands = 0 : i64, tpu.core_type = #tpu.core_type<tc>, window_params = [{transform_indices = @transform_0, window_bounds = array<i64: 16, 32>}, {pipeline_mode = #tpu.pipeline_mode<synchronous>, transform_indices = @transform_1, window_bounds = array<i64: 1, 32>}, {pipeline_mode = #tpu.pipeline_mode<synchronous>, transform_indices = @transform_2, window_bounds = array<i64: 1, 32>}, {transform_indices = @transform_3, window_bounds = array<i64: 1, 32, 64>}, {transform_indices = @transform_4, window_bounds = array<i64: 1, 1, 64>}, {transform_indices = @transform_5, window_bounds = array<i64: 1, 16, 64>}]} {
    %c0 = arith.constant 0 : index
    %c0_0 = arith.constant 0 : index
    %0 = vector.load %arg3[%c0, %c0_0] : memref<16x32xf32, #tpu.memory_space<vmem>>, vector<16x32xf32>
    %cst = arith.constant dense<0.000000e+00> : vector<16xf32>
    %1 = vector.multi_reduction <add>, %0, %cst [1] : vector<16x32xf32> to vector<16xf32>
    %2 = vector.shape_cast %1 : vector<16xf32> to vector<16x1xf32>
    %cst_1 = arith.constant 3.200000e+01 : f32
    %3 = vector.broadcast %cst_1 : f32 to vector<16x1xf32>
    %4 = arith.divf %2, %3 : vector<16x1xf32>
    %5 = vector.broadcast %4 : vector<16x1xf32> to vector<16x32xf32>
    %6 = arith.subf %0, %5 : vector<16x32xf32>
    %7 = arith.mulf %6, %6 : vector<16x32xf32>
    %cst_2 = arith.constant dense<0.000000e+00> : vector<16xf32>
    %8 = vector.multi_reduction <add>, %7, %cst_2 [1] : vector<16x32xf32> to vector<16xf32>
    %9 = vector.shape_cast %8 : vector<16xf32> to vector<16x1xf32>
    %cst_3 = arith.constant 3.200000e+01 : f32
    %10 = vector.broadcast %cst_3 : f32 to vector<16x1xf32>
    %11 = arith.divf %9, %10 : vector<16x1xf32>
    %12 = vector.broadcast %4 : vector<16x1xf32> to vector<16x32xf32>
    %13 = arith.subf %0, %12 : vector<16x32xf32>
    %cst_4 = arith.constant 9.99999974E-6 : f32
    %14 = vector.broadcast %cst_4 : f32 to vector<16x1xf32>
    %15 = arith.addf %11, %14 : vector<16x1xf32>
    %16 = math.rsqrt %15 : vector<16x1xf32>
    %17 = vector.broadcast %16 : vector<16x1xf32> to vector<16x32xf32>
    %18 = arith.mulf %13, %17 : vector<16x32xf32>
    %c0_5 = arith.constant 0 : index
    %c0_6 = arith.constant 0 : index
    %19 = vector.load %arg4[%c0_5, %c0_6] : memref<1x32xf32, #tpu.memory_space<vmem>>, vector<1x32xf32>
    %20 = vector.broadcast %19 : vector<1x32xf32> to vector<16x32xf32>
    %21 = arith.mulf %18, %20 : vector<16x32xf32>
    %c0_7 = arith.constant 0 : index
    %c0_8 = arith.constant 0 : index
    %22 = vector.load %arg5[%c0_7, %c0_8] : memref<1x32xf32, #tpu.memory_space<vmem>>, vector<1x32xf32>
    %23 = vector.broadcast %22 : vector<1x32xf32> to vector<16x32xf32>
    %24 = arith.addf %21, %23 : vector<16x32xf32>
    %c0_9 = arith.constant 0 : index
    %c0_10 = arith.constant 0 : index
    %c0_11 = arith.constant 0 : index
    %25 = vector.load %arg6[%c0_9, %c0_10, %c0_11] : memref<1x32x64xbf16, #tpu.memory_space<vmem>>, vector<1x32x64xbf16>
    %26 = vector.shape_cast %25 : vector<1x32x64xbf16> to vector<32x64xbf16>
    %27 = arith.truncf %24 : vector<16x32xf32> to vector<16x32xbf16>
    %cst_12 = arith.constant dense<0.000000e+00> : vector<16x64xf32>
    %28 = tpu.matmul %27, %26, %cst_12 {dimension_numbers = #tpu.dot_dimension_numbers<[1], [0], [0], [1], [0, 0, 1, 1], [], []>} : vector<16x32xbf16>, vector<32x64xbf16>, vector<16x64xf32> -> vector<16x64xf32>
    %c0_13 = arith.constant 0 : index
    %c0_14 = arith.constant 0 : index
    %c0_15 = arith.constant 0 : index
    %29 = vector.load %arg7[%c0_13, %c0_14, %c0_15] : memref<1x1x64xf32, #tpu.memory_space<vmem>>, vector<1x1x64xf32>
    %30 = vector.shape_cast %29 : vector<1x1x64xf32> to vector<1x64xf32>
    %31 = vector.broadcast %30 : vector<1x64xf32> to vector<16x64xf32>
    %32 = arith.addf %28, %31 : vector<16x64xf32>
    %c0_16 = arith.constant 0 : index
    %c0_17 = arith.constant 0 : index
    %c0_18 = arith.constant 0 : index
    %33 = vector.load %arg8[%c0_16, %c0_17, %c0_18] : memref<1x16x64xf32, #tpu.memory_space<vmem>>, vector<1x16x64xf32>
    %34 = vector.shape_cast %33 : vector<1x16x64xf32> to vector<16x64xf32>
    %35 = vector.shape_cast %32 : vector<16x64xf32> to vector<1x16x64xf32>
    tpu.vector_store %arg8[%c0_16, %c0_17, %c0_18], %35 {strides = array<i32>} : memref<1x16x64xf32, #tpu.memory_space<vmem>>, vector<1x16x64xf32>,
    return
  }
  func.func @transform_0(%arg0: i32, %arg1: i32, %arg2: i32) -> (i32, i32) {
    %c0_i32 = arith.constant 0 : i32
    %c0_i32_0 = arith.constant 0 : i32
    return %arg0, %c0_i32 : i32, i32
  }
  func.func @transform_1(%arg0: i32, %arg1: i32, %arg2: i32) -> (i32, i32) {
    %c0_i32 = arith.constant 0 : i32
    %c0_i32_0 = arith.constant 0 : i32
    %c0_i32_1 = arith.constant 0 : i32
    return %c0_i32, %c0_i32_0 : i32, i32
  }
  func.func @transform_2(%arg0: i32, %arg1: i32, %arg2: i32) -> (i32, i32) {
    %c0_i32 = arith.constant 0 : i32
    %c0_i32_0 = arith.constant 0 : i32
    %c0_i32_1 = arith.constant 0 : i32
    return %c0_i32, %c0_i32_0 : i32, i32
  }
  func.func @transform_3(%arg0: i32, %arg1: i32, %arg2: i32) -> (i32, i32, i32) {
    %c0_i32 = arith.constant 0 : i32
    %c0_i32_0 = arith.constant 0 : i32
    return %arg1, %c0_i32, %arg2 : i32, i32, i32
  }
  func.func @transform_4(%arg0: i32, %arg1: i32, %arg2: i32) -> (i32, i32, i32) {
    %c0_i32 = arith.constant 0 : i32
    %c0_i32_0 = arith.constant 0 : i32
    return %arg1, %c0_i32, %arg2 : i32, i32, i32
  }
  func.func @transform_5(%arg0: i32, %arg1: i32, %arg2: i32) -> (i32, i32, i32) {
    %c0_i32 = arith.constant 0 : i32
    return %arg1, %arg0, %arg2 : i32, i32, i32
  }
}

</mosaic_0001>

<bundles_post_ra>
// kernel: _lambda_.11
= control target key start
LH: loop header
LB: loop body
LE: loop exit
PB: predicated region body
PF: predicated region fallthrough
CT: control target
= control target key end

     0   :  { %s669_s18 = smov 0   ;;  %s671_s19 = smov 0   ;;  %s741_s0 = inlined_call_operand.vmem [shape: f32[16,32], index: 0, kind: input, shape index: {}]   ;;  %s742_s1 = inlined_call_operand.vmem [shape: f32[1,32], index: 1, kind: input, shape index: {}]   ;;  %s743_s2 = inlined_call_operand.vmem [shape: f32[1,32], index: 2, kind: input, shape index: {}]   ;;  %s744_s3 = inlined_call_operand.vmem [shape: bf16[3,32,32], index: 3, kind: input, shape index: {}]   ;;  %s745_s4 = inlined_call_operand.vmem [shape: f32[3,1,32], index: 4, kind: input, shape index: {}]   ;;  %s746_s5 = inlined_call_operand.vmem [shape: f32[3,16,32], index: 5, kind: output, shape index: {}]  }
   0x1   :  { %s673_s20 = smov 0  }
   0x2 LB: > { %s30_s21 = sadd.s32 1, %s632_s19  ;;  %p560_p0 = scmp.ge.s32.totalorder %s636_s20, 1  ;;  %s636_s20 = sphi %s673_s20, %s15_s20   ;;  %s632_s19 = sphi %s671_s19, %s748_s19   ;;  %s628_s18 = sphi %s669_s18, %s747_s18  }
   0x3   : > { %p32_p1 = scmp.ge.s32.totalorder %s30_s21, 3  ;;  %p239_p2 = scmp.lt.s32.totalorder %s636_s20, 4 }
   0x5   : > { %s750_s21 = smov (%p32_p1, %s30_s21), 0  ;;  %p240_p3 = pnand %p560_p0, %p239_p2 }
   0x6   : > { %p294_p4 = scmp.lt.s32.totalorder (!%p240_p3), %s628_s18, 2 }
   0x7   : > { %243 = sbr.rel (%p240_p3) target bundleno = 428 (0x1ac), region = 40 }
   0xc   : > { %v322_v0 = vld [vmem:[%s741_s0] sm:$0xff]  ;;  %vm324_vm0 = vcmask 261120   ;;  %v323_v2 = vld [vmem:[%s741_s0 + $0x8] sm:$0xff]  ;;  %v638_v4 = vmov 32.0   ;;  %s752_s18 = smov (!%p294_p4, %s628_s18), 2 }
   0xd   : > { %v325_v1 = vsel %vm324_vm0, %v322_v0, 0.0  ;;  %v328_v3 = vsel %vm324_vm0, %v323_v2, 0.0  ;;  %608 = vrcp.f32 %v638_v4  ;;  %s307_s28 = scalar_lea.vmem %s745_s4, %s752_s18  ;;  %s576_s29 = sshll.u32 %s752_s18, 4  ;;  %v605_v42 = vld [vmem:[%s742_s1] ss:$0 sm:$0xff] }
   0xe   : > { %326 = vadd.xlane.f32.xlu0 %v325_v1  ;;  %s301_s7 = scalar_lea.vmem %s744_s3, %s576_s29  ;;  %v606_v47 = vld [vmem:[%s743_s2] ss:$0 sm:$0xff]  ;;  %s319_s16 = scalar_lea.vmem %s746_s5, %s576_s29 }
   0xf   : > { %v579_v21 = vld [vmem:[%s301_s7 + $0x8] sm:$0xff]  ;;  %v578_v23 = vld [vmem:[%s301_s7] sm:$0xff] }
  0x10   : > { %418 = vmatpush.bf16.msra.mxu0 %v579_v21  ;;  %v607_v52 = vld [vmem:[%s307_s28] ss:$0 sm:$0xff] }
  0x13   : > { %v609_v5 = vpop.eup %608 }
  0x14   : > { %v332_v6 = vmul.f32 32.0, %v609_v5  ;;  %vm336_vm1 = vweird.f32 %v609_v5  ;;  %419 = vmatpush.bf16.msra.mxu0 %v578_v23 }
  0x16   : > { %329 = vadd.xlane.f32.xlu0 %v328_v3  ;;  %v333_v7 = vsub.f32 1.0, %v332_v6 }
  0x18   : > { %v334_v8 = vmul.f32 %v609_v5, %v333_v7 }
  0x1a   : > { %v335_v9 = vadd.f32 %v609_v5, %v334_v8 }
  0x1c   : > { %v337_v10 = vsel %vm336_vm1, %v609_v5, %v335_v9 }
  0x81   : > { %v327_v11 = vpop.xlane.xlu0 %326 }
  0x82   : > { %v338_v12 = vmul.f32 %v337_v10, %v327_v11 }
  0x84   : > { %v340_v13 = vsub.f32 %v322_v0, %v338_v12 }
  0x86   : > { %v342_v14 = vmul.f32 %v340_v13, %v340_v13 }
  0x88   : > { %v344_v15 = vsel %vm324_vm0, %v342_v14, 0.0 }
  0x89   : > { %345 = vadd.xlane.f32.xlu1 %v344_v15  ;;  %v330_v16 = vpop.xlane.xlu0 %329 }
  0x8a   : > { %v339_v17 = vmul.f32 %v337_v10, %v330_v16 }
  0x8c   : > { %v341_v18 = vsub.f32 %v323_v2, %v339_v17 }
  0x8e   : > { %v343_v19 = vmul.f32 %v341_v18, %v341_v18 }
  0x90   : > { %v347_v20 = vsel %vm324_vm0, %v343_v19, 0.0 }
  0x91   : > { %348 = vadd.xlane.f32.xlu1 %v347_v20 }
  0xfc   : > { %v346_v22 = vpop.xlane.xlu1 %345 }
  0xfd   : > { %v350_v24 = vmul.f32 %v346_v22, %v337_v10 }
  0xff   : > { %v352_v25 = vadd.f32 1e-05, %v350_v24 }
 0x101   : > { %610 = vrsqrt.f32 %v352_v25  ;;  %vm360_vm3 = vweird.f32 %v352_v25 }
 0x104   : > { %v349_v26 = vpop.xlane.xlu1 %348 }
 0x105   : > { %v351_v27 = vmul.f32 %v349_v26, %v337_v10 }
 0x107   : > { %v611_v28 = vpop.eup %610  ;;  %v353_v29 = vadd.f32 1e-05, %v351_v27 }
 0x108   : > { %v355_v30 = vmul.f32 %v611_v28, %v352_v25  ;;  %vm361_vm2 = vweird.f32 %v611_v28 }
 0x109   : > { %612 = vrsqrt.f32 %v353_v29  ;;  %vm362_vm4 = vmor %vm360_vm3, %vm361_vm2  ;;  %vm370_vm6 = vweird.f32 %v353_v29 }
 0x10a   : > { %v356_v31 = vmul.f32 %v611_v28, %v355_v30 }
 0x10c   : > { %v357_v32 = vmul.f32 0.5, %v356_v31 }
 0x10e   : > { %v358_v33 = vsub.f32 1.5, %v357_v32 }
 0x10f   : > { %v613_v34 = vpop.eup %612 }
 0x110   : > { %v359_v35 = vmul.f32 %v611_v28, %v358_v33  ;;  %v365_v36 = vmul.f32 %v613_v34, %v353_v29  ;;  %vm371_vm5 = vweird.f32 %v613_v34 }
 0x111   : > { %vm372_vm7 = vmor %vm370_vm6, %vm371_vm5 }
 0x112   : > { %v366_v37 = vmul.f32 %v613_v34, %v365_v36  ;;  %v363_v38 = vsel %vm362_vm4, %v611_v28, %v359_v35 }
 0x113   : > { %v374_v41 = vmul.f32 %v363_v38, %v340_v13 }
 0x114   : > { %v367_v39 = vmul.f32 0.5, %v366_v37 }
 0x115   : > { %v380_v46 = vmul.f32 %v605_v42, %v374_v41 }
 0x116   : > { %v368_v40 = vsub.f32 1.5, %v367_v39 }
 0x117   : > { %v386_v49 = vadd.f32 %v606_v47, %v380_v46 }
 0x118   : > { %v369_v43 = vmul.f32 %v613_v34, %v368_v40 }
 0x11a   : > { %v373_v44 = vsel %vm372_vm7, %v613_v34, %v369_v43 }
 0x11b   : > { %v375_v45 = vmul.f32 %v373_v44, %v341_v18 }
 0x11d   : > { %v381_v48 = vmul.f32 %v605_v42, %v375_v45 }
 0x11f   : > { %v387_v50 = vadd.f32 %v606_v47, %v381_v48 }
 0x121   : > { %v392_v51 = vpack.c.bf16 %v387_v50, %v386_v49 }
 0x123   : > { %573 = vmatmul.msk.bf16.vlgmr.msra.gmra.mxu0 %vm324_vm0, %v392_v51 }
 0x1a0   : > { %v421_v53 = vpop.f32.mrf.mxu0 }
 0x1a1   : > { %v422_v54 = vadd.f32 %v607_v52, %v421_v53 }
 0x1a3   : > { %426 = vst.msk [vmem:[%s319_s16] sm:$0xff] %vm324_vm0, %v422_v54 }
 0x1a8   : > { %v423_v55 = vpop.f32.mrf.mxu0 }
 0x1a9   : > { %v424_v56 = vadd.f32 %v607_v52, %v423_v55 }
 0x1ab   : > { %427 = vst.msk [vmem:[%s319_s16 + $0x8] sm:$0xff] %vm324_vm0, %v424_v56 }
 0x1ac PF: > { %s15_s20 = sadd.s32 1, %s636_s20   ;;  %s747_s18 = smov %s632_s19 }
 0x1ad   : > { %p12_p5 = scmp.ge.s32.totalorder %s15_s20, 5   ;;  %s748_s19 = smov %s750_s21 }
 0x1af   :  { %14 = sbr.rel (!%p12_p5) target bundleno = 2 (0x2), region = 76 }

// kernel: _lambda_.13
= control target key start
LH: loop header
LB: loop body
LE: loop exit
PB: predicated region body
PF: predicated region fallthrough
CT: control target
= control target key end

     0   :  { %vm41_vm0 = vcmask 261120   ;;  %s133_s1 = inlined_call_operand.vmem [shape: bf16[1,32,32], index: 1, kind: input, shape index: {}]   ;;  %s134_s0 = inlined_call_operand.vmem [shape: f32[16,32], index: 0, kind: input, shape index: {}]   ;;  %s135_s2 = inlined_call_operand.vmem [shape: f32[1,1,32], index: 2, kind: input, shape index: {}]   ;;  %s136_s3 = inlined_call_operand.vmem [shape: f32[1,16,32], index: 3, kind: input, shape index: {}, may-alias: {3,4}]   ;;  %s137_s4 = inlined_call_operand.vmem [shape: f32[1,16,32], index: 4, kind: output, shape index: {}, may-alias: {3,4}]  }
   0x1   :  { %v79_v0 = vld [vmem:[%s133_s1 + $0x8] sm:$0xff]  ;;  %v78_v1 = vld [vmem:[%s133_s1] sm:$0xff] }
   0x2   :  { %51 = vmatpush.bf16.msra.mxu0 %v79_v0  ;;  %v18_v2 = vld [vmem:[%s134_s0] sm:$0xff]  ;;  %v19_v3 = vld [vmem:[%s134_s0 + $0x8] sm:$0xff] }
   0x3   :  { %v24_v4 = vpack.c.bf16 %v19_v3, %v18_v2  ;;  %v80_v5 = vld [vmem:[%s135_s2] ss:$0 sm:$0xff] }
   0x4   :  { %v59_v7 = vld [vmem:[%s136_s3] sm:$0xff] }
   0x6   :  { %52 = vmatpush.bf16.msra.mxu0 %v78_v1 }
   0x9   :  { %77 = vmatmul.msk.bf16.vlgmr.msra.gmra.mxu0 %vm41_vm0, %v24_v4 }
  0x86   :  { %v54_v6 = vpop.f32.mrf.mxu0 }
  0x87   :  { %v55_v8 = vadd.f32 %v80_v5, %v54_v6 }
  0x89   :  { %v61_v9 = vadd.f32 %v59_v7, %v55_v8 }
  0x8b   :  { %63 = vst.msk [vmem:[%s137_s4] sm:$0xff] %vm41_vm0, %v61_v9 }
  0x8e   :  { %v56_v10 = vpop.f32.mrf.mxu0 }
  0x8f   :  { %v57_v12 = vadd.f32 %v80_v5, %v56_v10 }
  0x92   :  { %v60_v11 = vld [vmem:[%s136_s3 + $0x8] sm:$0xff] }
  0x93   :  { %v62_v13 = vadd.f32 %v60_v11, %v57_v12 }
  0x95   :  { %64 = vst.msk [vmem:[%s137_s4 + $0x8] sm:$0xff] %vm41_vm0, %v62_v13 }

// kernel: _lambda_.14
= control target key start
LH: loop header
LB: loop body
LE: loop exit
PB: predicated region body
PF: predicated region fallthrough
CT: control target
= control target key end

     0   :  { %vm23_vm0 = vcmask 261120   ;;  %v174_v4 = vmov 32.0   ;;  %s237_s0 = inlined_call_operand.vmem [shape: f32[16,32], index: 0, kind: input, shape index: {}]   ;;  %s238_s1 = inlined_call_operand.vmem [shape: f32[1,32], index: 1, kind: input, shape index: {}]   ;;  %s239_s2 = inlined_call_operand.vmem [shape: f32[1,32], index: 2, kind: input, shape index: {}]   ;;  %s240_s4 = inlined_call_operand.vmem [shape: f32[1,1,128], index: 4, kind: input, shape index: {}]   ;;  %s241_s3 = inlined_call_operand.vmem [shape: bf16[1,32,128], index: 3, kind: input, shape index: {}]   ;;  %s242_s5 = inlined_call_operand.vmem [shape: f32[1,16,128], index: 5, kind: output, shape index: {}]  }
   0x1   :  { %v21_v0 = vld [vmem:[%s237_s0] sm:$0xff]  ;;  %v22_v2 = vld [vmem:[%s237_s0 + $0x8] sm:$0xff]  ;;  %164 = vrcp.f32 %v174_v4 }
   0x2   :  { %v24_v1 = vsel %vm23_vm0, %v21_v0, 0.0  ;;  %v27_v3 = vsel %vm23_vm0, %v22_v2, 0.0  ;;  %v159_v21 = vld [vmem:[%s241_s3 + $0x8] sm:$0xff]  ;;  %v158_v23 = vld [vmem:[%s241_s3] sm:$0xff] }
   0x3   :  { %25 = vadd.xlane.f32.xlu0 %v24_v1  ;;  %117 = vmatpush.bf16.msra.mxu0 %v159_v21  ;;  %v161_v42 = vld [vmem:[%s238_s1] ss:$0 sm:$0xff] }
   0x4   :  { %v162_v47 = vld [vmem:[%s239_s2] ss:$0 sm:$0xff] }
   0x5   :  { %v163_v52 = vld [vmem:[%s240_s4] ss:$0 sm:$0xff] }
   0x7   :  { %v165_v5 = vpop.eup %164  ;;  %118 = vmatpush.bf16.msra.mxu0 %v158_v23 }
   0x8   :  { %v31_v6 = vmul.f32 32.0, %v165_v5  ;;  %vm35_vm1 = vweird.f32 %v165_v5 }
   0xa   :  { %v32_v7 = vsub.f32 1.0, %v31_v6 }
   0xb   :  { %28 = vadd.xlane.f32.xlu0 %v27_v3 }
   0xc   :  { %v33_v8 = vmul.f32 %v165_v5, %v32_v7 }
   0xe   :  { %v34_v9 = vadd.f32 %v165_v5, %v33_v8 }
  0x10   :  { %v36_v10 = vsel %vm35_vm1, %v165_v5, %v34_v9 }
  0x76   :  { %v26_v11 = vpop.xlane.xlu0 %25 }
  0x77   :  { %v37_v12 = vmul.f32 %v36_v10, %v26_v11 }
  0x79   :  { %v39_v13 = vsub.f32 %v21_v0, %v37_v12 }
  0x7b   :  { %v41_v14 = vmul.f32 %v39_v13, %v39_v13 }
  0x7d   :  { %v43_v15 = vsel %vm23_vm0, %v41_v14, 0.0 }
  0x7e   :  { %44 = vadd.xlane.f32.xlu1 %v43_v15  ;;  %v29_v16 = vpop.xlane.xlu0 %28 }
  0x7f   :  { %v38_v17 = vmul.f32 %v36_v10, %v29_v16 }
  0x81   :  { %v40_v18 = vsub.f32 %v22_v2, %v38_v17 }
  0x83   :  { %v42_v19 = vmul.f32 %v40_v18, %v40_v18 }
  0x85   :  { %v46_v20 = vsel %vm23_vm0, %v42_v19, 0.0 }
  0x86   :  { %47 = vadd.xlane.f32.xlu1 %v46_v20 }
  0xf1   :  { %v45_v22 = vpop.xlane.xlu1 %44 }
  0xf2   :  { %v49_v24 = vmul.f32 %v45_v22, %v36_v10 }
  0xf4   :  { %v51_v25 = vadd.f32 1e-05, %v49_v24 }
  0xf6   :  { %166 = vrsqrt.f32 %v51_v25  ;;  %vm59_vm3 = vweird.f32 %v51_v25 }
  0xf9   :  { %v48_v26 = vpop.xlane.xlu1 %47 }
  0xfa   :  { %v50_v27 = vmul.f32 %v48_v26, %v36_v10 }
  0xfc   :  { %v167_v28 = vpop.eup %166  ;;  %v52_v29 = vadd.f32 1e-05, %v50_v27 }
  0xfd   :  { %v54_v30 = vmul.f32 %v167_v28, %v51_v25  ;;  %vm60_vm2 = vweird.f32 %v167_v28 }
  0xfe   :  { %168 = vrsqrt.f32 %v52_v29  ;;  %vm61_vm4 = vmor %vm59_vm3, %vm60_vm2  ;;  %vm69_vm6 = vweird.f32 %v52_v29 }
  0xff   :  { %v55_v31 = vmul.f32 %v167_v28, %v54_v30 }
 0x101   :  { %v56_v32 = vmul.f32 0.5, %v55_v31 }
 0x103   :  { %v57_v33 = vsub.f32 1.5, %v56_v32 }
 0x104   :  { %v169_v34 = vpop.eup %168 }
 0x105   :  { %v58_v35 = vmul.f32 %v167_v28, %v57_v33  ;;  %v64_v36 = vmul.f32 %v169_v34, %v52_v29  ;;  %vm70_vm5 = vweird.f32 %v169_v34 }
 0x106   :  { %vm71_vm7 = vmor %vm69_vm6, %vm70_vm5 }
 0x107   :  { %v65_v37 = vmul.f32 %v169_v34, %v64_v36  ;;  %v62_v38 = vsel %vm61_vm4, %v167_v28, %v58_v35 }
 0x108   :  { %v73_v41 = vmul.f32 %v62_v38, %v39_v13 }
 0x109   :  { %v66_v39 = vmul.f32 0.5, %v65_v37 }
 0x10a   :  { %v79_v46 = vmul.f32 %v161_v42, %v73_v41 }
 0x10b   :  { %v67_v40 = vsub.f32 1.5, %v66_v39 }
 0x10c   :  { %v85_v49 = vadd.f32 %v162_v47, %v79_v46 }
 0x10d   :  { %v68_v43 = vmul.f32 %v169_v34, %v67_v40 }
 0x10f   :  { %v72_v44 = vsel %vm71_vm7, %v169_v34, %v68_v43 }
 0x110   :  { %v74_v45 = vmul.f32 %v72_v44, %v40_v18 }
 0x112   :  { %v80_v48 = vmul.f32 %v161_v42, %v74_v45 }
 0x114   :  { %v86_v50 = vadd.f32 %v162_v47, %v80_v48 }
 0x116   :  { %v91_v51 = vpack.c.bf16 %v86_v50, %v85_v49 }
 0x118   :  { %157 = vmatmul.msk.bf16.vlgmr.msra.gmra.mxu0 %vm23_vm0, %v91_v51 }
 0x195   :  { %v120_v53 = vpop.f32.mrf.mxu0 }
 0x196   :  { %v121_v54 = vadd.f32 %v163_v52, %v120_v53 }
 0x198   :  { %v127_v55 = vmul.f32 0.044715, %v121_v54  ;;  %v125_v4 = vmul.f32 0.5, %v121_v54 }
 0x19a   :  { %v129_v56 = vmul.f32 %v127_v55, %v121_v54 }
 0x19c   :  { %v131_v57 = vmul.f32 %v129_v56, %v121_v54 }
 0x19d   :  { %v122_v58 = vpop.f32.mrf.mxu0 }
 0x19e   :  { %v133_v59 = vadd.f32 %v131_v57, %v121_v54  ;;  %v123_v60 = vadd.f32 %v163_v52, %v122_v58 }
 0x1a0   :  { %v135_v61 = vmul.f32 0.7978846, %v133_v59  ;;  %v128_v62 = vmul.f32 0.044715, %v123_v60  ;;  %v126_v8 = vmul.f32 0.5, %v123_v60 }
 0x1a2   :  { %170 = vtanh.f32 %v135_v61  ;;  %v130_v63 = vmul.f32 %v128_v62, %v123_v60 }
 0x1a4   :  { %v132_v0 = vmul.f32 %v130_v63, %v123_v60 }
 0x1a6   :  { %v134_v1 = vadd.f32 %v132_v0, %v123_v60 }
 0x1a8   :  { %v171_v2 = vpop.eup %170  ;;  %v136_v3 = vmul.f32 0.7978846, %v134_v1 }
 0x1a9   :  { %v139_v5 = vadd.f32 1.0, %v171_v2 }
 0x1aa   :  { %172 = vtanh.f32 %v136_v3 }
 0x1ab   :  { %v141_v6 = vmul.f32 %v139_v5, %v125_v4 }
 0x1ad   :  { %143 = vst [vmem:[%s242_s5] sm:$0xff] %v141_v6 }
 0x1b0   :  { %v173_v7 = vpop.eup %172 }
 0x1b1   :  { %v140_v9 = vadd.f32 1.0, %v173_v7 }
 0x1b3   :  { %v142_v10 = vmul.f32 %v140_v9, %v126_v8 }
 0x1b5   :  { %144 = vst [vmem:[%s242_s5 + $0x8] sm:$0xff] %v142_v10 }

// kernel: _lambda_.12
= control target key start
LH: loop header
LB: loop body
LE: loop exit
PB: predicated region body
PF: predicated region fallthrough
CT: control target
= control target key end

     0   :  { %s1381_s12 = smov 0   ;;  %s1383_s13 = smov 0   ;;  %s1526_s0 = inlined_call_operand.vmem [shape: f32[3,16,32], index: 0, kind: input, shape index: {}, may-alias: {0,1,2}]   ;;  %s1527_s1 = inlined_call_operand.vmem [shape: f32[3,16,32], index: 1, kind: input, shape index: {}, may-alias: {0,1,2}]   ;;  %s1528_s2 = inlined_call_operand.vmem [shape: f32[3,16,32], index: 2, kind: input, shape index: {}, may-alias: {0,1,2}]   ;;  %s1529_s3 = inlined_call_operand.vmem [shape: f32[16,32], index: 3, kind: output, shape index: {}]  }
   0x1   :  { %s1385_s14 = smov 0  }
   0x2 LB: > { %s32_s15 = sadd.s32 1, %s1346_s13  ;;  %p1233_p0 = scmp.ge.s32.totalorder %s1350_s14, 1  ;;  %s1350_s14 = sphi %s1385_s14, %s13_s14   ;;  %s1346_s13 = sphi %s1383_s13, %s1531_s13   ;;  %s1342_s12 = sphi %s1381_s12, %s1530_s12  }
   0x3   : > { %p34_p1 = scmp.ge.s32.totalorder %s32_s15, 2  ;;  %p189_p2 = scmp.lt.s32.totalorder %s1350_s14, 3 }
   0x5   : > { %s1533_s15 = smov (%p34_p1, %s32_s15), 0  ;;  %p190_p3 = pnand %p1233_p0, %p189_p2 }
   0x6   : > { %p226_p4 = scmp.lt.s32.totalorder (!%p190_p3), %s1342_s12, 1  ;;  %s1352_s23 = smov (!%p190_p3), 120  }
   0x7   : > { %193 = sbr.rel (%p190_p3) target bundleno = 1125 (0x465), region = 32  ;;  %s1353_s24 = smov (!%p190_p3), 112  }
   0x8   : > { %s1354_s25 = smov (!%p190_p3), 104   ;;  %s1358_s5 = smov (!%p190_p3), 8  }
   0x9   : > { %s1359_s6 = smov (!%p190_p3), 24   ;;  %s1360_s7 = smov (!%p190_p3), 16  }
   0xc   : > { %s1535_s12 = smov (!%p226_p4, %s1342_s12), 1  ;;  %vm264_vm0 = vcmask 64512   ;;  %vm255_vm1 = vcmask 7168   ;;  %v1355_v3 = vmov -1e+30   ;;  %v646_v4 = vlaneseq }
   0xd   : > { %s1399_s16 = sshll.u32 %s1535_s12, 3  ;;  %256 = vst.msk [vmem:[#allocation2] sm:$0xff] %vm255_vm1, %v1355_v3  ;;  %v1356_v10 = vmov 0   ;;  %v1357_v11 = vmov 0.0  }
   0xe   : > { %s1174_s19 = scalar_lea.vmem %s1527_s1, %s1399_s16  ;;  %s229_s22 = scalar_lea.vmem %s1526_s0, %s1399_s16  ;;  %257 = vst.msk [vmem:[#allocation2 + $0x8] sm:$0xff] %vm255_vm1, %v1355_v3  ;;  %v1421_v5 = vshrl.u32 %v646_v4, 7  ;;  %v1423_v6 = vand.u32 127, %v646_v4  ;;  %1301 = vset.pattern.permute.xlu0 %v1356_v10  ;;  %1302 = vset.pattern.permute.xlu2 %v1356_v10 }
   0xf   : > { %v1252_v0 = vld [vmem:[%s1174_s19 + $0x10] sm:$0xff]  ;;  %v642_v1 = vld [vmem:[%s229_s22] sm:$0xff]  ;;  %258 = vst.msk [vmem:[#allocation2 + $0x10] sm:$0xff] %vm255_vm1, %v1355_v3  ;;  %1303 = vset.pattern.permute.xlu1 %v1356_v10  ;;  %s1177_s28 = scalar_lea.vmem %s1528_s2, %s1399_s16  ;;  %s249_s4 = scalar_lea.vmem %s1529_s3, %s1399_s16 }
  0x10   : > { %1254 = vmatpush.xpose.msk.msra.mxu0 %vm264_vm0, %v1252_v0  ;;  %v643_v2 = vmul.f32 0.35355338, %v642_v1  ;;  %742 = vrot.lane.b32.xlu1 %v1252_v0, %s1352_s23  ;;  %259 = vst.msk [vmem:[#allocation2 + $0x18] sm:$0xff] %vm255_vm1, %v1355_v3  ;;  %vm654_vm2 = vcmp.gt.s32.totalorder %v1423_v6, %v1421_v5  ;;  %v1253_v21 = vld [vmem:[%s1177_s28 + $0x20] sm:$0xff] }
  0x11   : > { %834 = vrot.lane.b32.xlu2 %v1252_v0, %s1353_s24  ;;  %260 = vst.msk [vmem:[#allocation3] sm:$0xff] %vm255_vm1, %v1357_v11  ;;  %724 = vmatpush.msra.mxu1 %v1253_v21 }
  0x12   : > { %261 = vst.msk [vmem:[#allocation3 + $0x8] sm:$0xff] %vm255_vm1, %v1357_v11 }
  0x13   : > { %1255 = vmatmul.msk.f32.vlgmr.msra.gmra.mxu0 %vm264_vm0, %v643_v2  ;;  %262 = vst.msk [vmem:[#allocation3 + $0x10] sm:$0xff] %vm255_vm1, %v1357_v11 }
  0x14   : > { %263 = vst.msk [vmem:[#allocation3 + $0x18] sm:$0xff] %vm255_vm1, %v1357_v11  ;;  %v1443_v17 = vld [vmem:[#allocation2] sm:$0xff] }
  0x15   : > { %265 = vst.msk [vmem:[#allocation4] sm:$0xff] %vm264_vm0, %v1357_v11  ;;  %v1469_v33 = vld [vmem:[#allocation2 + $0x8] sm:$0xff] }
  0x16   : > { %266 = vst.msk [vmem:[#allocation4 + $0x8] sm:$0xff] %vm264_vm0, %v1357_v11  ;;  %v862_v47 = vld [vmem:[#allocation2 + $0x10] sm:$0xff] }
  0x17   : > { %267 = vst.msk [vmem:[#allocation4 + $0x10] sm:$0xff] %vm264_vm0, %v1357_v11  ;;  %v953_v38 = vld [vmem:[#allocation2 + $0x18] sm:$0xff] }
  0x18   : > { %740 = vrot.lane.b32.xlu1 %v643_v2, %s1352_s23  ;;  %268 = vst.msk [vmem:[#allocation4 + $0x18] sm:$0xff] %vm264_vm0, %v1357_v11  ;;  %v731_v4 = vld [vmem:[#allocation3] sm:$0xff] }
  0x19   : > { %925 = vrot.lane.b32.xlu2 %v1252_v0, %s1354_s25 }
  0x20   : > { %832 = vrot.lane.b32.xlu1 %v643_v2, %s1353_s24 }
  0x21   : > { %923 = vrot.lane.b32.xlu2 %v643_v2, %s1354_s25 }
  0x6b   : > { %v835_v13 = vpop.permute.xlu2 %834 }
  0x6c   : > { %1260 = vmatpush.xpose.msk.msrb.mxu1 %vm264_vm0, %v835_v13 }
  0x73   : > { %v926_v15 = vpop.permute.xlu2 %925 }
  0x74   : > { %1263 = vmatpush.xpose.msk.msrb.mxu0 %vm264_vm0, %v926_v15 }
  0x7b   : > { %v924_v16 = vpop.permute.xlu2 %923 }
  0x7c   : > { %1264 = vmatmul.msk.f32.vlgmr.msrb.gmra.mxu0 %vm264_vm0, %v924_v16  ;;  %v824_v16 = vld [vmem:[#allocation3 + $0x8] sm:$0xff] }
  0x82   : > { %v743_v12 = vpop.permute.xlu1 %742 }
  0x83   : > { %1257 = vmatpush.xpose.msk.msra.mxu2 %vm264_vm0, %v743_v12 }
  0x8a   : > { %v741_v14 = vpop.permute.xlu1 %740 }
  0x8b   : > { %1258 = vmatmul.msk.f32.vlgmr.msra.gmra.mxu2 %vm264_vm0, %v741_v14 }
  0x90   : > { %v679_v7 = vpop.f32.mrf.mxu0 }
  0x91   : > { %v682_v8 = vsel %vm654_vm2, -1e+30, %v679_v7 }
  0x92   : > { %v684_v9 = vsel %vm264_vm0, %v682_v8, -inf  ;;  %v833_v32 = vpop.permute.xlu1 %832 }
  0x93   : > { %685 = vmax.xlane.f32.xlu0 %v684_v9 }
  0xf9   : > { %v948_v26 = vpop.f32.mrf.mxu0 }
  0xfa   : > { %v951_v28 = vsel %vm654_vm2, -1e+30, %v948_v26 }
  0xfb   : > { %v954_v29 = vsel %vm264_vm0, %v951_v28, -inf }
 0x106   : > { %v686_v18 = vpop.xlane.xlu0 %685 }
 0x107   : > { %v1446_v19 = vmax.f32 %v1443_v17, %v686_v18 }
 0x109   : > { %v688_v20 = vsub.f32 %v1443_v17, %v1446_v19  ;;  %739 = vst.msk [vmem:[#allocation2] sm:$0xff] %vm255_vm1, %v1446_v19  ;;  %693 = vperm.xlu0 %1301, %v1446_v19  }
 0x10b   : > { %v689_v2 = vmul.f32 1.442695, %v688_v20 }
 0x10e   : > { %v765_v22 = vpop.f32.mrf.mxu2 }
 0x10f   : > { %v768_v23 = vsel %vm654_vm2, -1e+30, %v765_v22 }
 0x110   : > { %v771_v25 = vsel %vm264_vm0, %v768_v23, -inf }
 0x111   : > { %772 = vmax.xlane.f32.xlu1 %v771_v25 }
 0x133   : > { %955 = vmax.xlane.f32.xlu0 %v954_v29 }
 0x147   : > { %795 = vrot.lane.b32.xlu0 %v1253_v21, %s1352_s23 }
 0x17b   : > { %v694_v24 = vpop.permute.xlu0 %693 }
 0x17c   : > { %v696_v27 = vsub.f32 %v682_v8, %v694_v24 }
 0x17e   : > { %v697_v30 = vmul.f32 1.442695, %v696_v27 }
 0x180   : > { %1304 = vpow2.f32 %v697_v30 }
 0x184   : > { %v773_v34 = vpop.xlane.xlu1 %772 }
 0x185   : > { %v1472_v35 = vmax.f32 %v1469_v33, %v773_v34 }
 0x186   : > { %v1305_v31 = vpop.eup %1304 }
 0x187   : > { %1256 = vmatmul.msk.f32.vlgmr.msra.gmra.mxu1 %vm264_vm0, %v1305_v31  ;;  %v775_v36 = vsub.f32 %v1469_v33, %v1472_v35  ;;  %831 = vst.msk [vmem:[#allocation2 + $0x8] sm:$0xff] %vm255_vm1, %v1472_v35  ;;  %v733_v45 = vsel %vm264_vm0, %v1305_v31, 0.0  ;;  %v970_v31 = vld [vmem:[#allocation4 + $0x18] sm:$0xff] }
 0x189   : > { %v776_v11 = vmul.f32 1.442695, %v775_v36 }
 0x18f   : > { %1261 = vmatmul.msk.f32.vlgmr.msrb.gmra.mxu1 %vm264_vm0, %v833_v32 }
 0x1a6   : > { %v956_v39 = vpop.xlane.xlu0 %955 }
 0x1a7   : > { %v957_v40 = vmax.f32 %v953_v38, %v956_v39 }
 0x1a9   : > { %v958_v41 = vsub.f32 %v953_v38, %v957_v40  ;;  %1013 = vst.msk [vmem:[#allocation2 + $0x18] sm:$0xff] %vm255_vm1, %v957_v40 }
 0x1ab   : > { %v959_v0 = vmul.f32 1.442695, %v958_v41 }
 0x1b9   : > { %v796_v46 = vpop.permute.xlu0 %795 }
 0x1ba   : > { %816 = vmatpush.msra.mxu3 %v796_v46 }
 0x204   : > { %v1478_v37 = vpop.f32.mrf.mxu1 }
 0x20c   : > { %v857_v42 = vpop.f32.mrf.mxu1 }
 0x20d   : > { %v860_v43 = vsel %vm654_vm2, -1e+30, %v857_v42 }
 0x20e   : > { %v863_v44 = vsel %vm264_vm0, %v860_v43, -inf }
 0x20f   : > { %864 = vmax.xlane.f32.xlu2 %v863_v44 }
 0x227   : > { %780 = vperm.xlu2 %1302, %v1472_v35  }
 0x22f   : > { %963 = vperm.xlu2 %1302, %v957_v40  }
 0x237   : > { %977 = vrot.lane.b32.xlu2 %v1253_v21, %s1354_s25 }
 0x260   : > { %734 = vadd.xlane.f32.xlu2 %v733_v45 }
 0x282   : > { %v865_v48 = vpop.xlane.xlu2 %864 }
 0x283   : > { %v866_v49 = vmax.f32 %v862_v47, %v865_v48 }
 0x285   : > { %922 = vst.msk [vmem:[#allocation2 + $0x10] sm:$0xff] %vm255_vm1, %v866_v49  ;;  %872 = vperm.xlu1 %1303, %v866_v49   ;;  %v867_v59 = vsub.f32 %v862_v47, %v866_v49 }
 0x287   : > { %v868_v62 = vmul.f32 1.442695, %v867_v59 }
 0x28a   : > { %v781_v50 = vpop.permute.xlu2 %780 }
 0x28b   : > { %v783_v51 = vsub.f32 %v768_v23, %v781_v50 }
 0x28d   : > { %v784_v52 = vmul.f32 1.442695, %v783_v51  ;;  %886 = vrot.lane.b32.xlu1 %v1253_v21, %s1353_s24  ;;  %v1006_v21 = vld [vmem:[#allocation3 + $0x18] sm:$0xff] }
 0x28f   : > { %1306 = vpow2.f32 %v784_v52 }
 0x292   : > { %v964_v53 = vpop.permute.xlu2 %963 }
 0x293   : > { %v966_v54 = vsub.f32 %v951_v28, %v964_v53 }
 0x295   : > { %v1307_v55 = vpop.eup %1306  ;;  %v967_v56 = vmul.f32 1.442695, %v966_v54 }
 0x296   : > { %1259 = vmatmul.msk.f32.vlgmr.msra.gmra.mxu3 %vm264_vm0, %v1307_v55  ;;  %v826_v57 = vsel %vm264_vm0, %v1307_v55, 0.0 }
 0x297   : > { %1308 = vpow2.f32 %v967_v56  ;;  %827 = vadd.xlane.f32.xlu0 %v826_v57 }
 0x298   : > { %1310 = vpow2.f32 %v868_v62 }
 0x299   : > { %1312 = vpow2.f32 %v959_v0  ;;  %v915_v0 = vld [vmem:[#allocation3 + $0x10] sm:$0xff] }
 0x29a   : > { %v978_v58 = vpop.permute.xlu2 %977  ;;  %1314 = vpow2.f32 %v689_v2 }
 0x29b   : > { %998 = vmatpush.msrb.mxu2 %v978_v58 }
 0x29d   : > { %v1309_v60 = vpop.eup %1308 }
 0x29e   : > { %1265 = vmatmul.msk.f32.vlgmr.msrb.gmra.mxu2 %vm264_vm0, %v1309_v60  ;;  %v1008_v61 = vsel %vm264_vm0, %v1309_v60, 0.0  ;;  %v1494_v63 = vpop.eup %1310 }
 0x29f   : > { %1009 = vadd.xlane.f32.xlu2 %v1008_v61  ;;  %v1313_v1 = vpop.eup %1312 }
 0x2a0   : > { %v1315_v3 = vpop.eup %1314  ;;  %v1007_v22 = vmul.f32 %v1313_v1, %v1006_v21 }
 0x2a1   : > { %v732_v5 = vmul.f32 %v1315_v3, %v731_v4 }
 0x2ab   : > { %882 = vperm.xlu0 %1301, %v1494_v63  }
 0x2b7   : > { %973 = vperm.xlu2 %1302, %v1313_v1   ;;  %v916_v1 = vmul.f32 %v1494_v63, %v915_v0 }
 0x2d3   : > { %v735_v6 = vpop.xlane.xlu2 %734 }
 0x2d4   : > { %v736_v7 = vadd.f32 %v735_v6, %v732_v5  ;;  %v879_v6 = vld [vmem:[#allocation4 + $0x10] sm:$0xff] }
 0x2d6   : > { %738 = vst.msk [vmem:[#allocation3] sm:$0xff] %vm255_vm1, %v736_v7 }
 0x2dd   : > { %v1018_v20 = vld [vmem:[#allocation3] sm:$0xff] }
 0x2de   : > { %v1030_v50 = vand.u32 2147483648, %v1018_v20  ;;  %vm1024_vm8 = vweird.f32 %v1018_v20  ;;  %v1028_v52 = vand.u32 2147483647, %v1018_v20 }
 0x2e0   : > { %v1031_v55 = vor.u32 1.1754944e-38, %v1030_v50  ;;  %vm1029_vm10 = vcmp.eq.f32.partialorder %v1028_v52, 8.507059e+37 }
 0x2f7   : > { %v873_v8 = vpop.permute.xlu1 %872 }
 0x2f8   : > { %v875_v9 = vsub.f32 %v860_v43, %v873_v8 }
 0x2fa   : > { %v876_v10 = vmul.f32 1.442695, %v875_v9 }
 0x2fc   : > { %1316 = vpow2.f32 %v876_v10 }
 0x2fd   : > { %1318 = vpow2.f32 %v776_v11 }
 0x2fe   : > { %1320 = vrcp.f32 %v1018_v20 }
 0x2ff   : > { %v887_v12 = vpop.permute.xlu1 %886 }
 0x300   : > { %907 = vmatpush.msrb.mxu3 %v887_v12 }
 0x302   : > { %v1317_v13 = vpop.eup %1316 }
 0x303   : > { %1262 = vmatmul.msk.f32.vlgmr.msrb.gmra.mxu3 %vm264_vm0, %v1317_v13  ;;  %v917_v14 = vsel %vm264_vm0, %v1317_v13, 0.0  ;;  %v1319_v15 = vpop.eup %1318 }
 0x304   : > { %918 = vadd.xlane.f32.xlu1 %v917_v14  ;;  %v825_v17 = vmul.f32 %v1319_v15, %v824_v16  ;;  %v1321_v26 = vpop.eup %1320 }
 0x305   : > { %v1020_v27 = vmul.f32 %v1321_v26, %v1018_v20  ;;  %vm1025_vm7 = vweird.f32 %v1321_v26 }
 0x306   : > { %vm1026_vm9 = vmor %vm1024_vm8, %vm1025_vm7 }
 0x307   : > { %v1021_v33 = vsub.f32 1.0, %v1020_v27 }
 0x309   : > { %v1022_v41 = vmul.f32 %v1321_v26, %v1021_v33 }
 0x30a   : > { %v828_v18 = vpop.xlane.xlu0 %827 }
 0x30b   : > { %v829_v19 = vadd.f32 %v828_v18, %v825_v17  ;;  %v1023_v49 = vadd.f32 %v1321_v26, %v1022_v41 }
 0x30d   : > { %830 = vst.msk [vmem:[#allocation3 + $0x8] sm:$0xff] %vm255_vm1, %v829_v19  ;;  %v1027_v53 = vsel %vm1026_vm9, %v1321_v26, %v1023_v49 }
 0x30e   : > { %v1032_v56 = vsel %vm1029_vm10, %v1031_v55, %v1027_v53 }
 0x312   : > { %v1010_v23 = vpop.xlane.xlu2 %1009 }
 0x313   : > { %v1011_v24 = vadd.f32 %v1010_v23, %v1007_v22 }
 0x314   : > { %v1044_v25 = vld [vmem:[#allocation3 + $0x8] sm:$0xff] }
 0x315   : > { %1012 = vst.msk [vmem:[#allocation3 + $0x18] sm:$0xff] %vm255_vm1, %v1011_v24  ;;  %1322 = vrcp.f32 %v1044_v25  ;;  %v1056_v35 = vand.u32 2147483648, %v1044_v25  ;;  %v1054_v39 = vand.u32 2147483647, %v1044_v25  ;;  %vm1050_vm4 = vweird.f32 %v1044_v25  ;;  %v787_v24 = vld [vmem:[#allocation4 + $0x8] sm:$0xff] }
 0x317   : > { %v1057_v45 = vor.u32 1.1754944e-38, %v1056_v35  ;;  %vm1055_vm6 = vcmp.eq.f32.partialorder %v1054_v39, 8.507059e+37 }
 0x319   : > { %v818_v4 = vpop.f32.mrf.mxu3 }
 0x31a   : > { %v974_v32 = vpop.permute.xlu2 %973 }
 0x31b   : > { %v1323_v28 = vpop.eup %1322  ;;  %v976_v36 = vmul.f32 %v974_v32, %v970_v31 }
 0x31c   : > { %v1046_v29 = vmul.f32 %v1323_v28, %v1044_v25  ;;  %v1104_v30 = vld [vmem:[#allocation3 + $0x18] sm:$0xff]  ;;  %vm1051_vm3 = vweird.f32 %v1323_v28 }
 0x31d   : > { %702 = vperm.xlu1 %1303, %v1315_v3   ;;  %1324 = vrcp.f32 %v1104_v30  ;;  %vm1052_vm5 = vmor %vm1050_vm4, %vm1051_vm3  ;;  %v1116_v58 = vand.u32 2147483648, %v1104_v30  ;;  %vm1110_vm12 = vweird.f32 %v1104_v30  ;;  %v1114_v59 = vand.u32 2147483647, %v1104_v30  ;;  %v883_v7 = vpop.permute.xlu0 %882 }
 0x31e   : > { %v1047_v34 = vsub.f32 1.0, %v1046_v29  ;;  %v885_v8 = vmul.f32 %v883_v7, %v879_v6  ;;  %vm1069_vm4 = vcmask 130112  }
 0x31f   : > { %v1117_v61 = vor.u32 1.1754944e-38, %v1116_v58  ;;  %vm1115_vm14 = vcmp.eq.f32.partialorder %v1114_v59, 8.507059e+37 }
 0x320   : > { %v1048_v38 = vmul.f32 %v1323_v28, %v1047_v34 }
 0x321   : > { %v1000_v40 = vpop.f32.mrf.mxu2 }
 0x322   : > { %v1003_v42 = vadd.f32 %v1000_v40, %v976_v36  ;;  %v1049_v43 = vadd.f32 %v1323_v28, %v1048_v38 }
 0x323   : > { %v1325_v44 = vpop.eup %1324 }
 0x324   : > { %1004 = vst.msk [vmem:[#allocation4 + $0x18] sm:$0xff] %vm264_vm0, %v1003_v42  ;;  %v1053_v46 = vsel %vm1052_vm5, %v1323_v28, %v1049_v43  ;;  %v1106_v47 = vmul.f32 %v1325_v44, %v1104_v30  ;;  %vm1111_vm11 = vweird.f32 %v1325_v44  ;;  %vm1099_vm5 = vcmask 195712  }
 0x325   : > { %790 = vperm.xlu1 %1303, %v1319_v15   ;;  %v1058_v48 = vsel %vm1055_vm6, %v1057_v45, %v1053_v46  ;;  %vm1112_vm13 = vmor %vm1110_vm12, %vm1111_vm11  ;;  %v699_v15 = vld [vmem:[#allocation4] sm:$0xff] }
 0x326   : > { %1061 = vperm.xlu0 %1301, %v1058_v48   ;;  %v1107_v51 = vsub.f32 1.0, %v1106_v47 }
 0x328   : > { %v1108_v54 = vmul.f32 %v1325_v44, %v1107_v51 }
 0x32a   : > { %v1109_v57 = vadd.f32 %v1325_v44, %v1108_v54 }
 0x32b   : > { %v1102_v33 = vld [vmem:[#allocation4 + $0x18] sm:$0xff] }
 0x32c   : > { %v1113_v60 = vsel %vm1112_vm13, %v1325_v44, %v1109_v57 }
 0x32d   : > { %1035 = vperm.xlu1 %1303, %v1032_v56   ;;  %v1118_v62 = vsel %vm1115_vm14, %v1117_v61, %v1113_v60 }
 0x335   : > { %1121 = vperm.xlu1 %1303, %v1118_v62  }
 0x377   : > { %v919_v2 = vpop.xlane.xlu1 %918 }
 0x378   : > { %v920_v3 = vadd.f32 %v919_v2, %v916_v1 }
 0x37a   : > { %921 = vst.msk [vmem:[#allocation3 + $0x10] sm:$0xff] %vm255_vm1, %v920_v3 }
 0x381   : > { %v1074_v5 = vld [vmem:[#allocation3 + $0x10] sm:$0xff] }
 0x382   : > { %1326 = vrcp.f32 %v1074_v5  ;;  %v1086_v14 = vand.u32 2147483648, %v1074_v5  ;;  %v1084_v16 = vand.u32 2147483647, %v1074_v5  ;;  %vm1080_vm1 = vweird.f32 %v1074_v5 }
 0x384   : > { %v1087_v20 = vor.u32 1.1754944e-38, %v1086_v14  ;;  %vm1085_vm3 = vcmp.eq.f32.partialorder %v1084_v16, 8.507059e+37 }
 0x386   : > { %v909_v9 = vpop.f32.mrf.mxu3 }
 0x387   : > { %v912_v10 = vadd.f32 %v909_v9, %v885_v8 }
 0x388   : > { %v1327_v11 = vpop.eup %1326 }
 0x389   : > { %913 = vst.msk [vmem:[#allocation4 + $0x10] sm:$0xff] %vm264_vm0, %v912_v10  ;;  %v1076_v12 = vmul.f32 %v1327_v11, %v1074_v5  ;;  %vm1081_vm15 = vweird.f32 %v1327_v11 }
 0x38a   : > { %vm1082_vm2 = vmor %vm1080_vm1, %vm1081_vm15 }
 0x38b   : > { %v1077_v13 = vsub.f32 1.0, %v1076_v12 }
 0x38d   : > { %v1078_v63 = vmul.f32 %v1327_v11, %v1077_v13 }
 0x38f   : > { %v703_v17 = vpop.permute.xlu1 %702  ;;  %v1079_v18 = vadd.f32 %v1327_v11, %v1078_v63 }
 0x390   : > { %v705_v19 = vmul.f32 %v703_v17, %v699_v15  ;;  %v1072_v38 = vld [vmem:[#allocation4 + $0x10] sm:$0xff] }
 0x391   : > { %v1083_v21 = vsel %vm1082_vm2, %v1327_v11, %v1079_v18 }
 0x392   : > { %v729_v22 = vadd.f32 %v1478_v37, %v705_v19  ;;  %v1088_v23 = vsel %vm1085_vm3, %v1087_v20, %v1083_v21 }
 0x393   : > { %1091 = vperm.xlu0 %1301, %v1088_v23  }
 0x394   : > { %730 = vst.msk [vmem:[#allocation4] sm:$0xff] %vm264_vm0, %v729_v22 }
 0x397   : > { %v791_v25 = vpop.permute.xlu1 %790 }
 0x398   : > { %v793_v26 = vmul.f32 %v791_v25, %v787_v24  ;;  %v1062_v37 = vpop.permute.xlu0 %1061 }
 0x39a   : > { %v821_v27 = vadd.f32 %v818_v4, %v793_v26 }
 0x39b   : > { %v1017_v28 = vld [vmem:[#allocation4] sm:$0xff] }
 0x39c   : > { %822 = vst.msk [vmem:[#allocation4 + $0x8] sm:$0xff] %vm264_vm0, %v821_v27 }
 0x39f   : > { %v1036_v29 = vpop.permute.xlu1 %1035 }
 0x3a0   : > { %v1038_v30 = vmul.f32 %v1036_v29, %v1017_v28 }
 0x3a2   : > { %1040 = vst.msk [vmem:[%s249_s4] sm:$0xff] %vm264_vm0, %v1038_v30  ;;  %vm1129_vm0 = vcmask 261312  }
 0x3a3   : > { %v1042_v31 = vld [vmem:[#allocation4 + $0x8] sm:$0xff] }
 0x3a4   : > { %v1064_v32 = vmul.f32 %v1062_v37, %v1042_v31 }
 0x3a6   : > { %1066 = vrot.lane.b32.xlu2 %v1064_v32, %s1358_s5 }
 0x3a7   : > { %v1122_v34 = vpop.permute.xlu1 %1121 }
 0x3a8   : > { %v1124_v35 = vmul.f32 %v1122_v34, %v1102_v33 }
 0x3aa   : > { %1126 = vrot.lane.b32.xlu0 %v1124_v35, %s1359_s6 }
 0x400   : > { %v1067_v36 = vpop.permute.xlu2 %1066 }
 0x401   : > { %1070 = vst.msk [vmem:[%s249_s4] sm:$0xff] %vm1069_vm4, %v1067_v36 }
 0x405   : > { %v1092_v39 = vpop.permute.xlu0 %1091 }
 0x406   : > { %v1094_v40 = vmul.f32 %v1092_v39, %v1072_v38 }
 0x408   : > { %1096 = vrot.lane.b32.xlu2 %v1094_v40, %s1360_s7 }
 0x41c   : > { %v1127_v42 = vpop.permute.xlu0 %1126 }
 0x462   : > { %v1097_v41 = vpop.permute.xlu2 %1096 }
 0x463   : > { %1100 = vst.msk [vmem:[%s249_s4] sm:$0xff] %vm1099_vm5, %v1097_v41 }
 0x464   : > { %1130 = vst.msk [vmem:[%s249_s4] sm:$0xff] %vm1129_vm0, %v1127_v42 }
 0x465 PF: > { %s13_s14 = sadd.s32 1, %s1350_s14   ;;  %s1530_s12 = smov %s1346_s13 }
 0x466   : > { %p10_p5 = scmp.ge.s32.totalorder %s13_s14, 4   ;;  %s1531_s13 = smov %s1533_s15 }
 0x468   :  { %12 = sbr.rel (!%p10_p5) target bundleno = 2 (0x2), region = 108 }

// kernel: _lambda_.15
= control target key start
LH: loop header
LB: loop body
LE: loop exit
PB: predicated region body
PF: predicated region fallthrough
CT: control target
= control target key end

     0   :  { %vm106_vm0 = vcmask 261120   ;;  %s224_s1 = inlined_call_operand.vmem [shape: bf16[1,128,32], index: 1, kind: input, shape index: {}]   ;;  %s225_s2 = inlined_call_operand.vmem [shape: f32[1,1,32], index: 2, kind: input, shape index: {}]   ;;  %s226_s0 = inlined_call_operand.vmem [shape: f32[16,128], index: 0, kind: input, shape index: {}]   ;;  %s227_s3 = inlined_call_operand.vmem [shape: f32[1,16,32], index: 3, kind: input, shape index: {}, may-alias: {3,4}]   ;;  %s228_s4 = inlined_call_operand.vmem [shape: f32[1,16,32], index: 4, kind: output, shape index: {}, may-alias: {3,4}]  }
   0x1   :  { %v152_v0 = vld [vmem:[%s224_s1 + $0x38] sm:$0xff]  ;;  %v151_v1 = vld [vmem:[%s224_s1 + $0x30] sm:$0xff]  ;;  %v150_v2 = vld [vmem:[%s224_s1 + $0x28] sm:$0xff] }
   0x2   :  { %88 = vmatpush.bf16.msra.mxu0 %v152_v0  ;;  %v149_v3 = vld [vmem:[%s224_s1 + $0x20] sm:$0xff]  ;;  %v148_v4 = vld [vmem:[%s224_s1 + $0x18] sm:$0xff]  ;;  %v147_v5 = vld [vmem:[%s224_s1 + $0x10] sm:$0xff] }
   0x3   :  { %v146_v6 = vld [vmem:[%s224_s1 + $0x8] sm:$0xff]  ;;  %v145_v7 = vld [vmem:[%s224_s1] sm:$0xff] }
   0x4   :  { %v17_v8 = vld [vmem:[%s226_s0] sm:$0xff]  ;;  %v18_v9 = vld [vmem:[%s226_s0 + $0x8] sm:$0xff] }
   0x5   :  { %v35_v10 = vpack.c.bf16 %v18_v9, %v17_v8  ;;  %v153_v11 = vld [vmem:[%s225_s2] ss:$0 sm:$0xff] }
   0x6   :  { %89 = vmatpush.bf16.msra.mxu0 %v151_v1  ;;  %v102_v13 = vld [vmem:[%s227_s3] sm:$0xff] }
   0xa   :  { %90 = vmatpush.bf16.msra.mxu0 %v150_v2 }
   0xe   :  { %91 = vmatpush.bf16.msra.mxu0 %v149_v3 }
  0x12   :  { %92 = vmatpush.bf16.msra.mxu0 %v148_v4 }
  0x16   :  { %93 = vmatpush.bf16.msra.mxu0 %v147_v5 }
  0x1a   :  { %94 = vmatpush.bf16.msra.mxu0 %v146_v6 }
  0x1e   :  { %95 = vmatpush.bf16.msra.mxu0 %v145_v7 }
  0x21   :  { %96 = vmatmul.bf16.vlgmr.msra.gmra.mxu0 %v35_v10 }
  0x9e   :  { %v97_v12 = vpop.f32.mrf.mxu0 }
  0x9f   :  { %v98_v14 = vadd.f32 %v153_v11, %v97_v12 }
  0xa1   :  { %v104_v15 = vadd.f32 %v102_v13, %v98_v14 }
  0xa3   :  { %107 = vst.msk [vmem:[%s228_s4] sm:$0xff] %vm106_vm0, %v104_v15 }
  0xa6   :  { %v99_v16 = vpop.f32.mrf.mxu0 }
  0xa7   :  { %v100_v18 = vadd.f32 %v153_v11, %v99_v16 }
  0xaa   :  { %v103_v17 = vld [vmem:[%s227_s3 + $0x8] sm:$0xff] }
  0xab   :  { %v105_v19 = vadd.f32 %v103_v17, %v100_v18 }
  0xad   :  { %108 = vst.msk [vmem:[%s228_s4 + $0x8] sm:$0xff] %vm106_vm0, %v105_v19 }

// kernel: _lambda_.21
= control target key start
LH: loop header
LB: loop body
LE: loop exit
PB: predicated region body
PF: predicated region fallthrough
CT: control target
= control target key end

     0   :  { %vm24_vm0 = vcmask 261120   ;;  %s260_s0 = inlined_call_operand.vmem [shape: f32[16,32], index: 0, kind: input, shape index: {}]   ;;  %s261_s1 = inlined_call_operand.vmem [shape: f32[1,32], index: 1, kind: input, shape index: {}]   ;;  %s262_s2 = inlined_call_operand.vmem [shape: f32[1,32], index: 2, kind: input, shape index: {}]   ;;  %s263_s3 = inlined_call_operand.vmem [shape: bf16[1,32,64], index: 3, kind: input, shape index: {}]   ;;  %s264_s4 = inlined_call_operand.vmem [shape: f32[1,1,64], index: 4, kind: input, shape index: {}]   ;;  %s265_s5 = inlined_call_operand.hbm [shape: f32[1,16,64], index: 5, kind: output, shape index: {}]  }
   0x1   :  { %v22_v0 = vld [vmem:[%s260_s0] sm:$0xff] }
   0x2   :  { %v25_v1 = vsel %vm24_vm0, %v22_v0, 0.0 }
   0x3   :  { %26 = vadd.xlane.f32.xlu0 %v25_v1 }
   0x4   :  { %10 = vsyncpa [#allocation3], 0  ;;  %v23_v2 = vld [vmem:[%s260_s0 + $0x8] sm:$0xff]  ;;  %v197_v4 = vmov 32.0   ;;  %v156_v23 = vld [vmem:[%s263_s3] sm:$0xff]  ;;  %vm126_vm8 = vcmask 523264  }
   0x5   :  { %v28_v3 = vsel %vm24_vm0, %v23_v2, 0.0  ;;  %165 = vrcp.f32 %v197_v4  ;;  %v157_v21 = vld [vmem:[%s263_s3 + $0x8] sm:$0xff]  ;;  %v162_v42 = vld [vmem:[%s261_s1] ss:$0 sm:$0xff]  ;;  %s198_s1 = smov [#allocation2]   ;;  %s199_s8 = smov 128  }
   0x6   :  { %118 = vmatpush.bf16.msra.mxu0 %v157_v21  ;;  %v163_v47 = vld [vmem:[%s262_s2] ss:$0 sm:$0xff]  ;;  %s133_s30 = sshll.u32 %s198_s1, 4  ;;  %s135_s2 = sshll.u32 %s265_s5, 4  ;;  %s134_s30 = int_to_ptr.vmem [resolvable:$true] %s133_s30  ;;  %s136_s2 = int_to_ptr.hbm [resolvable:$true] %s135_s2 }
   0x7   :  { %v164_v52 = vld [vmem:[%s264_s4] ss:$0 sm:$0xff]  ;;  %s200_s9 = smov 8  }
   0xa   :  { %119 = vmatpush.bf16.msra.mxu0 %v156_v23 }
   0xb   :  { %29 = vadd.xlane.f32.xlu0 %v28_v3  ;;  %v166_v5 = vpop.eup %165 }
   0xc   :  { %v32_v6 = vmul.f32 32.0, %v166_v5  ;;  %vm36_vm1 = vweird.f32 %v166_v5 }
   0xe   :  { %v33_v7 = vsub.f32 1.0, %v32_v6 }
  0x10   :  { %v34_v8 = vmul.f32 %v166_v5, %v33_v7 }
  0x12   :  { %v35_v9 = vadd.f32 %v166_v5, %v34_v8 }
  0x14   :  { %v37_v10 = vsel %vm36_vm1, %v166_v5, %v35_v9 }
  0x76   :  { %v27_v11 = vpop.xlane.xlu0 %26 }
  0x77   :  { %v38_v12 = vmul.f32 %v37_v10, %v27_v11 }
  0x79   :  { %v40_v13 = vsub.f32 %v22_v0, %v38_v12 }
  0x7b   :  { %v42_v14 = vmul.f32 %v40_v13, %v40_v13 }
  0x7d   :  { %v44_v15 = vsel %vm24_vm0, %v42_v14, 0.0 }
  0x7e   :  { %45 = vadd.xlane.f32.xlu1 %v44_v15  ;;  %v30_v16 = vpop.xlane.xlu0 %29 }
  0x7f   :  { %v39_v17 = vmul.f32 %v37_v10, %v30_v16 }
  0x81   :  { %v41_v18 = vsub.f32 %v23_v2, %v39_v17 }
  0x83   :  { %v43_v19 = vmul.f32 %v41_v18, %v41_v18 }
  0x85   :  { %v47_v20 = vsel %vm24_vm0, %v43_v19, 0.0 }
  0x86   :  { %48 = vadd.xlane.f32.xlu1 %v47_v20 }
  0xf1   :  { %v46_v22 = vpop.xlane.xlu1 %45 }
  0xf2   :  { %v50_v24 = vmul.f32 %v46_v22, %v37_v10 }
  0xf4   :  { %v52_v25 = vadd.f32 1e-05, %v50_v24 }
  0xf6   :  { %167 = vrsqrt.f32 %v52_v25  ;;  %vm60_vm3 = vweird.f32 %v52_v25 }
  0xf9   :  { %v49_v26 = vpop.xlane.xlu1 %48 }
  0xfa   :  { %v51_v27 = vmul.f32 %v49_v26, %v37_v10 }
  0xfc   :  { %v168_v28 = vpop.eup %167  ;;  %v53_v29 = vadd.f32 1e-05, %v51_v27 }
  0xfd   :  { %v55_v30 = vmul.f32 %v168_v28, %v52_v25  ;;  %vm61_vm2 = vweird.f32 %v168_v28 }
  0xfe   :  { %169 = vrsqrt.f32 %v53_v29  ;;  %vm62_vm4 = vmor %vm60_vm3, %vm61_vm2  ;;  %vm70_vm6 = vweird.f32 %v53_v29 }
  0xff   :  { %v56_v31 = vmul.f32 %v168_v28, %v55_v30 }
 0x101   :  { %v57_v32 = vmul.f32 0.5, %v56_v31 }
 0x103   :  { %v58_v33 = vsub.f32 1.5, %v57_v32 }
 0x104   :  { %v170_v34 = vpop.eup %169 }
 0x105   :  { %v59_v35 = vmul.f32 %v168_v28, %v58_v33  ;;  %v65_v36 = vmul.f32 %v170_v34, %v53_v29  ;;  %vm71_vm5 = vweird.f32 %v170_v34 }
 0x106   :  { %vm72_vm7 = vmor %vm70_vm6, %vm71_vm5 }
 0x107   :  { %v66_v37 = vmul.f32 %v170_v34, %v65_v36  ;;  %v63_v38 = vsel %vm62_vm4, %v168_v28, %v59_v35 }
 0x108   :  { %v74_v41 = vmul.f32 %v63_v38, %v40_v13 }
 0x109   :  { %v67_v39 = vmul.f32 0.5, %v66_v37 }
 0x10a   :  { %v80_v46 = vmul.f32 %v162_v42, %v74_v41 }
 0x10b   :  { %v68_v40 = vsub.f32 1.5, %v67_v39 }
 0x10c   :  { %v86_v49 = vadd.f32 %v163_v47, %v80_v46 }
 0x10d   :  { %v69_v43 = vmul.f32 %v170_v34, %v68_v40 }
 0x10f   :  { %v73_v44 = vsel %vm72_vm7, %v170_v34, %v69_v43 }
 0x110   :  { %v75_v45 = vmul.f32 %v73_v44, %v41_v18 }
 0x112   :  { %v81_v48 = vmul.f32 %v162_v42, %v75_v45 }
 0x114   :  { %v87_v50 = vadd.f32 %v163_v47, %v81_v48 }
 0x116   :  { %v92_v51 = vpack.c.bf16 %v87_v50, %v86_v49 }
 0x118   :  { %155 = vmatmul.msk.bf16.vlgmr.msra.gmra.mxu0 %vm24_vm0, %v92_v51 }
 0x195   :  { %v121_v53 = vpop.f32.mrf.mxu0 }
 0x196   :  { %v122_v54 = vadd.f32 %v164_v52, %v121_v53 }
 0x198   :  { %127 = vst.msk [vmem:[#allocation2] sm:$0xff] %vm126_vm8, %v122_v54 }
 0x19d   :  { %v123_v55 = vpop.f32.mrf.mxu0 }
 0x19e   :  { %v124_v56 = vadd.f32 %v164_v52, %v123_v55 }
 0x1a0   :  { %128 = vst.msk [vmem:[#allocation2 + $0x8] sm:$0xff] %vm126_vm8, %v124_v56 }
 0x1a1   :  { %141 = dma.vmem_to_hbm [thread:$0]  %s134_s30, 256, %s136_s2, [#allocation3], %s199_s8, %s199_s8, %s200_s9  }
 0x1a2   :  { %195 = dma.done.wait [#allocation3], 256  }
 0x1a3   :  { %196 = vsyncadd [#allocation3], 4294967040 }
 0x1a4   :  { %146 = vsyncpa [#allocation3], 1 }

</bundles_post_ra>
